<compile_context>
chip_gen: v7x
topology: tpu7x:2x2x1
jax: 0.10.0
libtpu: 0.0.40
codegen_flags: <defaults>
</compile_context>

<pallas_src>
import jax
import jax.numpy as jnp
from jax.experimental import pallas as pl
from jax.experimental.pallas import tpu as pltpu

# ----------------------------- small BERT config ------------------------------
VOCAB = 128
HIDDEN = 128
N_HEADS = 4
HEAD_DIM = HIDDEN // N_HEADS     # 32
N_LAYERS = 2
INTER = 256
MAX_POS = 64
TYPE_VOCAB = 2
LN_EPS = 1e-12

BATCH = 2
SEQ = 16
M = BATCH * SEQ                  # rows of the [M, HIDDEN] activation slab
W3 = 3 * HIDDEN                  # packed per-layer vector slab width

PARAM_DTYPE = jnp.bfloat16       # MXU operand dtype for the big projections
ACC_DTYPE = jnp.float32          # accumulation / LN / softmax dtype


# ----------------------------- in-kernel helpers -------------------------------
def _layernorm(x, g, b):
    mean = jnp.mean(x, axis=-1, keepdims=True)
    xc = x - mean
    var = jnp.mean(xc * xc, axis=-1, keepdims=True)
    return xc * jax.lax.rsqrt(var + LN_EPS) * g + b


def _gelu(x):
    # TODO(synk): BERT uses erf-based GELU; tanh approximation kept for robust Mosaic lowering.
    c = 0.7978845608028654  # sqrt(2/pi)
    return 0.5 * x * (1.0 + jnp.tanh(c * (x + 0.044715 * x * x * x)))


# ----------------------------- fused encoder kernel ----------------------------
def _bert_stack_kernel(
    ids_ref,                                    # [M, 1] int32 (word ids, column layout)
    mask_ref,                                   # [BATCH, SEQ] int32 attention mask
    wordemb_ref,                                # [VOCAB, HIDDEN] f32
    postype_ref,                                # [SEQ, HIDDEN] f32 (pos_emb[:S] + type_emb[0])
    embln_ref,                                  # [2, HIDDEN] f32  (row0=gamma, row1=beta)
    wqkv_ref,                                   # [1, HIDDEN, 3H] bf16
    wo_ref,                                     # [1, HIDDEN, HIDDEN] bf16
    wi_ref,                                     # [1, HIDDEN, INTER] bf16
    wf_ref,                                     # [1, INTER, HIDDEN] bf16
    vec_ref,                                    # [1, 8, 3H] f32 packed small vectors
    pool_w_ref,                                 # [HIDDEN, HIDDEN] bf16
    pool_b_ref,                                 # [1, HIDDEN] f32
    out_ref,                                    # [BATCH, HIDDEN] f32
    hidden_ref,                                 # VMEM scratch [M, HIDDEN] f32 (persists)
    bias_ref,                                   # VMEM scratch [BATCH, SEQ] f32 (key-pad bias)
):
    layer = pl.program_id(0)

    # ---- layer 0: in-kernel embedding gather (one-hot matmul) + LayerNorm + mask bias ----
    @pl.when(layer == 0)
    def _():
        onehot = jnp.where(
            jax.lax.broadcasted_iota(jnp.int32, (M, VOCAB), 1) == ids_ref[...],
            1.0, 0.0).astype(ACC_DTYPE)                                    # [M, VOCAB]
        wemb = jnp.dot(onehot, wordemb_ref[...],
                       preferred_element_type=ACC_DTYPE)                   # [M, H]
        emb = (wemb.reshape(BATCH, SEQ, HIDDEN)
               + postype_ref[...][None, :, :]).reshape(M, HIDDEN)
        hidden_ref[...] = _layernorm(emb, embln_ref[0:1, :], embln_ref[1:2, :])
        # HF-style additive key-padding bias: (1 - mask) * -10000, layer-invariant
        bias_ref[...] = (mask_ref[...].astype(ACC_DTYPE) - 1.0) * 10000.0

    h = hidden_ref[...]                                                    # [M, H] f32

    # ---- packed per-layer vectors (biases + LN params) ----
    vecs = vec_ref[0]                                                      # [8, 3H] f32
    bqkv = vecs[0:1, :]                      # [1, 3H]
    bo = vecs[1:2, :HIDDEN]
    ln1g = vecs[2:3, :HIDDEN]
    ln1b = vecs[3:4, :HIDDEN]
    bi = vecs[4:5, :INTER]
    bfb = vecs[5:6, :HIDDEN]
    ln2g = vecs[6:7, :HIDDEN]
    ln2b = vecs[7:8, :HIDDEN]

    # ---- fused QKV projection: one lane-dense [M, 3H] matmul ----
    qkv = jnp.dot(h.astype(PARAM_DTYPE), wqkv_ref[0],
                  preferred_element_type=ACC_DTYPE) + bqkv                 # [M, 3H] f32

    # ---- batched multi-head attention (no misaligned head slices / transposes) ----
    # Head separation is done with lane-selector masks on K (and on the PV result),
    # so all matmuls contract the full 128-lane axis and stay MXU/lane-dense.
    G = N_HEADS * BATCH
    scale = 1.0 / float(HEAD_DIM) ** 0.5

    q3 = qkv[:, :HIDDEN].reshape(BATCH, SEQ, HIDDEN)                       # lane-aligned
    k3 = qkv[:, HIDDEN:2 * HIDDEN].reshape(BATCH, SEQ, HIDDEN)
    v3 = qkv[:, 2 * HIDDEN:].reshape(BATCH, SEQ, HIDDEN)

    lane = jax.lax.broadcasted_iota(jnp.int32, (N_HEADS, HIDDEN), 1)
    head = jax.lax.broadcasted_iota(jnp.int32, (N_HEADS, HIDDEN), 0)
    hmask = jnp.where((lane >= head * HEAD_DIM) & (lane < (head + 1) * HEAD_DIM),
                      1.0, 0.0).astype(ACC_DTYPE).reshape(N_HEADS, 1, 1, HIDDEN)

    kmask = (k3[None, :, :, :] * hmask).reshape(G, SEQ, HIDDEN)            # [G, S, H]
    qb = jnp.broadcast_to(q3[None], (N_HEADS, BATCH, SEQ, HIDDEN)).reshape(G, SEQ, HIDDEN)
    vb = jnp.broadcast_to(v3[None], (N_HEADS, BATCH, SEQ, HIDDEN)).reshape(G, SEQ, HIDDEN)

    s = jnp.einsum('gqd,gkd->gqk', qb, kmask,
                   preferred_element_type=ACC_DTYPE) * scale               # [G, S, S]
    s = s.reshape(N_HEADS, BATCH, SEQ, SEQ) + bias_ref[...][None, :, None, :]
    mmax = jnp.max(s, axis=-1, keepdims=True)
    p = jnp.exp(s - mmax)
    p = p * pl.reciprocal(jnp.sum(p, axis=-1, keepdims=True), approx=True)

    ctx_full = jnp.einsum('gqk,gkd->gqd', p.reshape(G, SEQ, SEQ), vb,
                          preferred_element_type=ACC_DTYPE)                # [G, S, H]
    ctx = jnp.sum(ctx_full.reshape(N_HEADS, BATCH, SEQ, HIDDEN) * hmask,
                  axis=0).reshape(M, HIDDEN)                               # [M, H] lane-dense

    # ---- attention output projection + residual + LayerNorm (fused epilogue) ----
    attn = jnp.dot(ctx.astype(PARAM_DTYPE), wo_ref[0],
                   preferred_element_type=ACC_DTYPE) + bo
    h1 = _layernorm(attn + h, ln1g, ln1b)

    # ---- feed-forward (GELU) + residual + LayerNorm (fused epilogue) ----
    inter = _gelu(jnp.dot(h1.astype(PARAM_DTYPE), wi_ref[0],
                          preferred_element_type=ACC_DTYPE) + bi)
    ffn = jnp.dot(inter.astype(PARAM_DTYPE), wf_ref[0],
                  preferred_element_type=ACC_DTYPE) + bfb
    h2 = _layernorm(ffn + h1, ln2g, ln2b)
    hidden_ref[...] = h2

    # ---- pooler fused at the last layer: dense(tanh) on the strided [CLS] rows ----
    @pl.when(layer == pl.num_programs(0) - 1)
    def _():
        cls = hidden_ref[pl.ds(0, BATCH, stride=SEQ), :]                   # rows 0, SEQ, ...
        pooled = jnp.tanh(
            jnp.dot(cls.astype(PARAM_DTYPE), pool_w_ref[...],
                    preferred_element_type=ACC_DTYPE) + pool_b_ref[...])
        out_ref[...] = pooled


# ----------------------------- host-side wrapper --------------------------------
def bert_pooler_output(params, word_ids, attention_mask):
    """Equivalent of MyBertModel.forward: returns pooler_output [B, HIDDEN]."""
    B, S = word_ids.shape
    assert (B, S) == (BATCH, SEQ)

    ids = word_ids.reshape(M, 1).astype(jnp.int32)      # column layout -> cheap lane-bcast
    mask = attention_mask.astype(jnp.int32)

    def fixed(shape):       # grid-invariant full-array block (stays VMEM-resident)
        return pl.BlockSpec(shape, lambda l: (0, 0))

    def per_layer(shape):   # stacked per-layer block -> double-buffered weight prefetch
        return pl.BlockSpec((1,) + tuple(shape[1:]), lambda l: (l, 0, 0))

    L = N_LAYERS
    grid_spec = pltpu.PrefetchScalarGridSpec(
        num_scalar_prefetch=0,
        grid=(N_LAYERS,),
        in_specs=[
            fixed((M, 1)),                           # ids
            fixed((BATCH, SEQ)),                     # attention mask
            fixed((VOCAB, HIDDEN)),                  # word embedding table
            fixed((SEQ, HIDDEN)),                    # pos+type embeddings
            fixed((2, HIDDEN)),                      # embedding LN (gamma, beta)
            per_layer((L, HIDDEN, 3 * HIDDEN)),      # wqkv (bf16)
            per_layer((L, HIDDEN, HIDDEN)),          # wo   (bf16)
            per_layer((L, HIDDEN, INTER)),           # wi   (bf16)
            per_layer((L, INTER, HIDDEN)),           # wf   (bf16)
            per_layer((L, 8, W3)),                   # packed biases / LN params (f32)
            fixed((HIDDEN, HIDDEN)),                 # pool_w
            fixed((1, HIDDEN)),                      # pool_b
        ],
        out_specs=pl.BlockSpec((BATCH, HIDDEN), lambda l: (0, 0)),
        scratch_shapes=[pltpu.VMEM((M, HIDDEN), jnp.float32),
                        pltpu.VMEM((BATCH, SEQ), jnp.float32)],
    )

    return pl.pallas_call(
        _bert_stack_kernel,
        out_shape=jax.ShapeDtypeStruct((BATCH, HIDDEN), jnp.float32),
        grid_spec=grid_spec,
        compiler_params=pltpu.CompilerParams(
            dimension_semantics=("arbitrary",)),     # layers are sequential
    )(ids, mask, params["word_emb"], params["pos_type_emb"], params["emb_ln"],
      params["wqkv"], params["wo"], params["wi"], params["wf"], params["vecs"],
      params["pool_w"], params["pool_b"])


# ----------------------------- parameter init -----------------------------------
def init_params(key):
    def normal(k, shape, scale=0.02):
        return scale * jax.random.normal(k, shape, dtype=jnp.float32)

    def row(v):  # pad a 1-D vector to the packed slab width (3H)
        return jnp.pad(v, (0, W3 - v.shape[0]))

    keys = jax.random.split(key, 4 + N_LAYERS)
    wqkv, wo, wi, wf, vecs = [], [], [], [], []
    for l in range(N_LAYERS):
        lk = jax.random.split(keys[4 + l], 6)
        wq = normal(lk[0], (HIDDEN, HIDDEN))
        wk = normal(lk[1], (HIDDEN, HIDDEN))
        wv = normal(lk[2], (HIDDEN, HIDDEN))
        wqkv.append(jnp.concatenate([wq, wk, wv], axis=1))            # fused [H, 3H]
        wo.append(normal(lk[3], (HIDDEN, HIDDEN)))
        wi.append(normal(lk[4], (HIDDEN, INTER)))
        wf.append(normal(lk[5], (INTER, HIDDEN)))
        vecs.append(jnp.stack([
            row(jnp.zeros((W3,), jnp.float32)),          # 0: bqkv
            row(jnp.zeros((HIDDEN,), jnp.float32)),      # 1: bo
            row(jnp.ones((HIDDEN,), jnp.float32)),       # 2: ln1_gamma
            row(jnp.zeros((HIDDEN,), jnp.float32)),      # 3: ln1_beta
            row(jnp.zeros((INTER,), jnp.float32)),       # 4: bi
            row(jnp.zeros((HIDDEN,), jnp.float32)),      # 5: bf
            row(jnp.ones((HIDDEN,), jnp.float32)),       # 6: ln2_gamma
            row(jnp.zeros((HIDDEN,), jnp.float32)),      # 7: ln2_beta
        ]))

    word_emb = normal(keys[0], (VOCAB, HIDDEN))
    pos_emb = normal(keys[1], (MAX_POS, HIDDEN))
    type_emb = normal(keys[2], (TYPE_VOCAB, HIDDEN))

    return {
        "word_emb": word_emb,
        "pos_type_emb": pos_emb[:SEQ] + type_emb[0][None, :],   # token_type_ids = 0
        "emb_ln": jnp.stack([jnp.ones((HIDDEN,), jnp.float32),
                             jnp.zeros((HIDDEN,), jnp.float32)]),
        "pool_w": normal(keys[3], (HIDDEN, HIDDEN)).astype(PARAM_DTYPE),
        "pool_b": jnp.zeros((1, HIDDEN), jnp.float32),
        "wqkv": jnp.stack(wqkv).astype(PARAM_DTYPE),
        "wo": jnp.stack(wo).astype(PARAM_DTYPE),
        "wi": jnp.stack(wi).astype(PARAM_DTYPE),
        "wf": jnp.stack(wf).astype(PARAM_DTYPE),
        "vecs": jnp.stack(vecs),
    }


# ----------------------------------- main ---------------------------------------
if __name__ == "__main__":
    key = jax.random.PRNGKey(0)
    pkey, idkey = jax.random.split(key)
    params = init_params(pkey)

    # deterministic example inputs (analogue of inputs['word'], inputs['mask'])
    word_ids = jax.random.randint(idkey, (BATCH, SEQ), 0, VOCAB, dtype=jnp.int32)
    mask = jnp.concatenate(
        [jnp.ones((BATCH, SEQ - 4), jnp.int32), jnp.zeros((BATCH, 4), jnp.int32)], axis=1
    )  # last 4 positions are padding (as produced by tokenize())

    fwd = jax.jit(bert_pooler_output)
    out = jax.block_until_ready(fwd(params, word_ids, mask))
    assert out.shape == (BATCH, HIDDEN) and out.dtype == jnp.float32
    assert bool(jnp.all(jnp.isfinite(out)))
    print("KERNEL_OK")
</pallas_src>

<mosaic_0001>
module attributes {stable_mosaic.version = 11 : i64} {
  func.func @_bert_stack_kernel(%arg0: i32, %arg1: memref<32x1xi32, #tpu.memory_space<vmem>>, %arg2: memref<2x16xi32, #tpu.memory_space<vmem>>, %arg3: memref<128x128xf32, #tpu.memory_space<vmem>>, %arg4: memref<16x128xf32, #tpu.memory_space<vmem>>, %arg5: memref<2x128xf32, #tpu.memory_space<vmem>>, %arg6: memref<1x128x384xbf16, #tpu.memory_space<vmem>>, %arg7: memref<1x128x128xbf16, #tpu.memory_space<vmem>>, %arg8: memref<1x128x256xbf16, #tpu.memory_space<vmem>>, %arg9: memref<1x256x128xbf16, #tpu.memory_space<vmem>>, %arg10: memref<1x8x384xf32, #tpu.memory_space<vmem>>, %arg11: memref<128x128xbf16, #tpu.memory_space<vmem>>, %arg12: memref<1x128xf32, #tpu.memory_space<vmem>>, %arg13: memref<2x128xf32, #tpu.memory_space<vmem>>, %arg14: memref<32x128xf32, #tpu.memory_space<vmem>>, %arg15: memref<2x16xf32, #tpu.memory_space<vmem>>) attributes {dimension_semantics = [#tpu.dimension_semantics<arbitrary>], iteration_bounds = array<i64: 2>, scalar_prefetch = 0 : i64, scratch_operands = 2 : i64, tpu.core_type = #tpu.core_type<tc>, window_params = [{pipeline_mode = #tpu.pipeline_mode<synchronous>, transform_indices = @transform_0, window_bounds = array<i64: 32, 1>}, {pipeline_mode = #tpu.pipeline_mode<synchronous>, transform_indices = @transform_1, window_bounds = array<i64: 2, 16>}, {pipeline_mode = #tpu.pipeline_mode<synchronous>, transform_indices = @transform_2, window_bounds = array<i64: 128, 128>}, {pipeline_mode = #tpu.pipeline_mode<synchronous>, transform_indices = @transform_3, window_bounds = array<i64: 16, 128>}, {pipeline_mode = #tpu.pipeline_mode<synchronous>, transform_indices = @transform_4, window_bounds = array<i64: 2, 128>}, {transform_indices = @transform_5, window_bounds = array<i64: 1, 128, 384>}, {transform_indices = @transform_6, window_bounds = array<i64: 1, 128, 128>}, {transform_indices = @transform_7, window_bounds = array<i64: 1, 128, 256>}, {transform_indices = @transform_8, window_bounds = array<i64: 1, 256, 128>}, {transform_indices = @transform_9, window_bounds = array<i64: 1, 8, 384>}, {pipeline_mode = #tpu.pipeline_mode<synchronous>, transform_indices = @transform_10, window_bounds = array<i64: 128, 128>}, {pipeline_mode = #tpu.pipeline_mode<synchronous>, transform_indices = @transform_11, window_bounds = array<i64: 1, 128>}, {pipeline_mode = #tpu.pipeline_mode<synchronous>, transform_indices = @transform_12, window_bounds = array<i64: 2, 128>}]} {
    %c0_i32 = arith.constant 0 : i32
    %0 = arith.cmpi eq, %arg0, %c0_i32 : i32
    %1 = arith.extui %0 : i1 to i32
    %c0_i32_0 = arith.constant 0 : i32
    %2 = arith.cmpi ne, %1, %c0_i32_0 : i32
    scf.if %2 {
      %156 = tpu.iota {dimensions = array<i32: 1>} : vector<32x128xi32>
      %c0_49 = arith.constant 0 : index
      %c0_50 = arith.constant 0 : index
      %157 = vector.load %arg1[%c0_49, %c0_50] : memref<32x1xi32, #tpu.memory_space<vmem>>, vector<32x1xi32>
      %158 = vector.broadcast %157 : vector<32x1xi32> to vector<32x128xi32>
      %159 = arith.cmpi eq, %156, %158 : vector<32x128xi32>
      %cst_51 = arith.constant 1.000000e+00 : f32
      %cst_52 = arith.constant 0.000000e+00 : f32
      %160 = vector.broadcast %cst_51 : f32 to vector<32x128xf32>
      %161 = vector.broadcast %cst_52 : f32 to vector<32x128xf32>
      %162 = arith.select %159, %160, %161 : vector<32x128xi1>, vector<32x128xf32>
      %c0_53 = arith.constant 0 : index
      %c0_54 = arith.constant 0 : index
      %163 = vector.load %arg3[%c0_53, %c0_54] : memref<128x128xf32, #tpu.memory_space<vmem>>, vector<128x128xf32>
      %cst_55 = arith.constant dense<0.000000e+00> : vector<32x128xf32>
      %164 = tpu.matmul %162, %163, %cst_55 {dimension_numbers = #tpu.dot_dimension_numbers<[1], [0], [0], [1], [0, 0, 1, 1], [], []>} : vector<32x128xf32>, vector<128x128xf32>, vector<32x128xf32> -> vector<32x128xf32>
      %165 = vector.shape_cast %164 : vector<32x128xf32> to vector<2x16x128xf32>
      %c0_56 = arith.constant 0 : index
      %c0_57 = arith.constant 0 : index
      %166 = vector.load %arg4[%c0_56, %c0_57] : memref<16x128xf32, #tpu.memory_space<vmem>>, vector<16x128xf32>
      %167 = vector.shape_cast %166 : vector<16x128xf32> to vector<1x16x128xf32>
      %168 = vector.broadcast %167 : vector<1x16x128xf32> to vector<2x16x128xf32>
      %169 = arith.addf %165, %168 : vector<2x16x128xf32>
      %170 = vector.shape_cast %169 : vector<2x16x128xf32> to vector<32x128xf32>
      %c0_58 = arith.constant 0 : index
      %c0_59 = arith.constant 0 : index
      %171 = vector.load %arg5[%c0_58, %c0_59] : memref<2x128xf32, #tpu.memory_space<vmem>>, vector<1x128xf32>
      %c1 = arith.constant 1 : index
      %c0_60 = arith.constant 0 : index
      %172 = vector.load %arg5[%c1, %c0_60] : memref<2x128xf32, #tpu.memory_space<vmem>>, vector<1x128xf32>
      %cst_61 = arith.constant dense<0.000000e+00> : vector<32xf32>
      %173 = vector.multi_reduction <add>, %170, %cst_61 [1] : vector<32x128xf32> to vector<32xf32>
      %174 = vector.shape_cast %173 : vector<32xf32> to vector<32x1xf32>
      %cst_62 = arith.constant 1.280000e+02 : f32
      %175 = vector.broadcast %cst_62 : f32 to vector<32x1xf32>
      %176 = arith.divf %174, %175 : vector<32x1xf32>
      %177 = vector.broadcast %176 : vector<32x1xf32> to vector<32x128xf32>
      %178 = arith.subf %170, %177 : vector<32x128xf32>
      %179 = arith.mulf %178, %178 : vector<32x128xf32>
      %cst_63 = arith.constant dense<0.000000e+00> : vector<32xf32>
      %180 = vector.multi_reduction <add>, %179, %cst_63 [1] : vector<32x128xf32> to vector<32xf32>
      %181 = vector.shape_cast %180 : vector<32xf32> to vector<32x1xf32>
      %cst_64 = arith.constant 1.280000e+02 : f32
      %182 = vector.broadcast %cst_64 : f32 to vector<32x1xf32>
      %183 = arith.divf %181, %182 : vector<32x1xf32>
      %cst_65 = arith.constant 9.99999996E-13 : f32
      %184 = vector.broadcast %cst_65 : f32 to vector<32x1xf32>
      %185 = arith.addf %183, %184 : vector<32x1xf32>
      %186 = math.rsqrt %185 : vector<32x1xf32>
      %187 = vector.broadcast %186 : vector<32x1xf32> to vector<32x128xf32>
      %188 = arith.mulf %178, %187 : vector<32x128xf32>
      %189 = vector.broadcast %171 : vector<1x128xf32> to vector<32x128xf32>
      %190 = arith.mulf %188, %189 : vector<32x128xf32>
      %191 = vector.broadcast %172 : vector<1x128xf32> to vector<32x128xf32>
      %192 = arith.addf %190, %191 : vector<32x128xf32>
      %c0_66 = arith.constant 0 : index
      %c0_67 = arith.constant 0 : index
      %193 = vector.load %arg14[%c0_66, %c0_67] : memref<32x128xf32, #tpu.memory_space<vmem>>, vector<32x128xf32>
      tpu.vector_store %arg14[%c0_66, %c0_67], %192 {strides = array<i32>} : memref<32x128xf32, #tpu.memory_space<vmem>>, vector<32x128xf32>,
      %c0_68 = arith.constant 0 : index
      %c0_69 = arith.constant 0 : index
      %194 = vector.load %arg2[%c0_68, %c0_69] : memref<2x16xi32, #tpu.memory_space<vmem>>, vector<2x16xi32>
      %195 = arith.sitofp %194 : vector<2x16xi32> to vector<2x16xf32>
      %cst_70 = arith.constant 1.000000e+00 : f32
      %196 = vector.broadcast %cst_70 : f32 to vector<2x16xf32>
      %197 = arith.subf %195, %196 : vector<2x16xf32>
      %cst_71 = arith.constant 1.000000e+04 : f32
      %198 = vector.broadcast %cst_71 : f32 to vector<2x16xf32>
      %199 = arith.mulf %197, %198 : vector<2x16xf32>
      %c0_72 = arith.constant 0 : index
      %c0_73 = arith.constant 0 : index
      %200 = vector.load %arg15[%c0_72, %c0_73] : memref<2x16xf32, #tpu.memory_space<vmem>>, vector<2x16xf32>
      tpu.vector_store %arg15[%c0_72, %c0_73], %199 {strides = array<i32>} : memref<2x16xf32, #tpu.memory_space<vmem>>, vector<2x16xf32>,
    } else {
    }
    %c0 = arith.constant 0 : index
    %c0_1 = arith.constant 0 : index
    %3 = vector.load %arg14[%c0, %c0_1] : memref<32x128xf32, #tpu.memory_space<vmem>>, vector<32x128xf32>
    %c0_2 = arith.constant 0 : index
    %c0_3 = arith.constant 0 : index
    %c0_4 = arith.constant 0 : index
    %4 = vector.load %arg10[%c0_2, %c0_3, %c0_4] : memref<1x8x384xf32, #tpu.memory_space<vmem>>, vector<1x8x384xf32>
    %5 = vector.shape_cast %4 : vector<1x8x384xf32> to vector<8x384xf32>
    %6 = vector.extract_strided_slice %5 {offsets = [0, 0], sizes = [1, 384], strides = [1, 1]} : vector<8x384xf32> to vector<1x384xf32>
    %7 = vector.extract_strided_slice %5 {offsets = [1, 0], sizes = [1, 128], strides = [1, 1]} : vector<8x384xf32> to vector<1x128xf32>
    %8 = vector.extract_strided_slice %5 {offsets = [2, 0], sizes = [1, 128], strides = [1, 1]} : vector<8x384xf32> to vector<1x128xf32>
    %9 = vector.extract_strided_slice %5 {offsets = [3, 0], sizes = [1, 128], strides = [1, 1]} : vector<8x384xf32> to vector<1x128xf32>
    %10 = vector.extract_strided_slice %5 {offsets = [4, 0], sizes = [1, 256], strides = [1, 1]} : vector<8x384xf32> to vector<1x256xf32>
    %11 = vector.extract_strided_slice %5 {offsets = [5, 0], sizes = [1, 128], strides = [1, 1]} : vector<8x384xf32> to vector<1x128xf32>
    %12 = vector.extract_strided_slice %5 {offsets = [6, 0], sizes = [1, 128], strides = [1, 1]} : vector<8x384xf32> to vector<1x128xf32>
    %13 = vector.extract_strided_slice %5 {offsets = [7, 0], sizes = [1, 128], strides = [1, 1]} : vector<8x384xf32> to vector<1x128xf32>
    %14 = arith.truncf %3 : vector<32x128xf32> to vector<32x128xbf16>
    %c0_5 = arith.constant 0 : index
    %c0_6 = arith.constant 0 : index
    %c0_7 = arith.constant 0 : index
    %15 = vector.load %arg6[%c0_5, %c0_6, %c0_7] : memref<1x128x384xbf16, #tpu.memory_space<vmem>>, vector<1x128x384xbf16>
    %16 = vector.shape_cast %15 : vector<1x128x384xbf16> to vector<128x384xbf16>
    %cst = arith.constant dense<0.000000e+00> : vector<32x384xf32>
    %17 = tpu.matmul %14, %16, %cst {dimension_numbers = #tpu.dot_dimension_numbers<[1], [0], [0], [1], [0, 0, 1, 1], [], []>} : vector<32x128xbf16>, vector<128x384xbf16>, vector<32x384xf32> -> vector<32x384xf32>
    %18 = vector.broadcast %6 : vector<1x384xf32> to vector<32x384xf32>
    %19 = arith.addf %17, %18 : vector<32x384xf32>
    %20 = vector.extract_strided_slice %19 {offsets = [0, 0], sizes = [32, 128], strides = [1, 1]} : vector<32x384xf32> to vector<32x128xf32>
    %21 = vector.shape_cast %20 : vector<32x128xf32> to vector<2x16x128xf32>
    %22 = vector.extract_strided_slice %19 {offsets = [0, 128], sizes = [32, 128], strides = [1, 1]} : vector<32x384xf32> to vector<32x128xf32>
    %23 = vector.shape_cast %22 : vector<32x128xf32> to vector<2x16x128xf32>
    %24 = vector.extract_strided_slice %19 {offsets = [0, 256], sizes = [32, 128], strides = [1, 1]} : vector<32x384xf32> to vector<32x128xf32>
    %25 = vector.shape_cast %24 : vector<32x128xf32> to vector<2x16x128xf32>
    %26 = tpu.iota {dimensions = array<i32: 1>} : vector<4x128xi32>
    %27 = tpu.iota {dimensions = array<i32: 0>} : vector<4x128xi32>
    %c32_i32 = arith.constant 32 : i32
    %28 = vector.broadcast %c32_i32 : i32 to vector<4x128xi32>
    %29 = arith.muli %27, %28 : vector<4x128xi32>
    %30 = arith.cmpi sge, %26, %29 : vector<4x128xi32>
    %c1_i32 = arith.constant 1 : i32
    %31 = vector.broadcast %c1_i32 : i32 to vector<4x128xi32>
    %32 = arith.addi %27, %31 : vector<4x128xi32>
    %c32_i32_8 = arith.constant 32 : i32
    %33 = vector.broadcast %c32_i32_8 : i32 to vector<4x128xi32>
    %34 = arith.muli %32, %33 : vector<4x128xi32>
    %35 = arith.cmpi slt, %26, %34 : vector<4x128xi32>
    %36 = arith.andi %30, %35 : vector<4x128xi1>
    %cst_9 = arith.constant 1.000000e+00 : f32
    %cst_10 = arith.constant 0.000000e+00 : f32
    %37 = vector.broadcast %cst_9 : f32 to vector<4x128xf32>
    %38 = vector.broadcast %cst_10 : f32 to vector<4x128xf32>
    %39 = arith.select %36, %37, %38 : vector<4x128xi1>, vector<4x128xf32>
    %40 = vector.shape_cast %39 : vector<4x128xf32> to vector<4x1x1x128xf32>
    %41 = vector.shape_cast %23 : vector<2x16x128xf32> to vector<1x2x16x128xf32>
    %42 = vector.broadcast %41 : vector<1x2x16x128xf32> to vector<4x2x16x128xf32>
    %43 = vector.broadcast %40 : vector<4x1x1x128xf32> to vector<4x2x16x128xf32>
    %44 = arith.mulf %42, %43 : vector<4x2x16x128xf32>
    %45 = vector.shape_cast %44 : vector<4x2x16x128xf32> to vector<8x16x128xf32>
    %46 = vector.shape_cast %21 : vector<2x16x128xf32> to vector<1x2x16x128xf32>
    %47 = vector.shape_cast %46 : vector<1x2x16x128xf32> to vector<1x2x16x128xf32>
    %48 = vector.broadcast %47 : vector<1x2x16x128xf32> to vector<4x2x16x128xf32>
    %49 = vector.shape_cast %48 : vector<4x2x16x128xf32> to vector<8x16x128xf32>
    %50 = vector.shape_cast %25 : vector<2x16x128xf32> to vector<1x2x16x128xf32>
    %51 = vector.shape_cast %50 : vector<1x2x16x128xf32> to vector<1x2x16x128xf32>
    %52 = vector.broadcast %51 : vector<1x2x16x128xf32> to vector<4x2x16x128xf32>
    %53 = vector.shape_cast %52 : vector<4x2x16x128xf32> to vector<8x16x128xf32>
    "tpu.trace_start"() <{level = 10 : i32, message = "gqd,gkd->gqk"}> : () -> ()
    %cst_11 = arith.constant dense<0.000000e+00> : vector<8x16x16xf32>
    %54 = tpu.matmul %49, %45, %cst_11 {dimension_numbers = #tpu.dot_dimension_numbers<[2], [2], [1], [1], [0, 0, 0, 1, 1, 1], [0], [0]>} : vector<8x16x128xf32>, vector<8x16x128xf32>, vector<8x16x16xf32> -> vector<8x16x16xf32>
    "tpu.trace_stop"() : () -> ()
    %cst_12 = arith.constant 0.176776692 : f32
    %55 = vector.broadcast %cst_12 : f32 to vector<8x16x16xf32>
    %56 = arith.mulf %54, %55 : vector<8x16x16xf32>
    %57 = vector.shape_cast %56 : vector<8x16x16xf32> to vector<4x2x16x16xf32>
    %c0_13 = arith.constant 0 : index
    %c0_14 = arith.constant 0 : index
    %58 = vector.load %arg15[%c0_13, %c0_14] : memref<2x16xf32, #tpu.memory_space<vmem>>, vector<2x16xf32>
    %59 = vector.shape_cast %58 : vector<2x16xf32> to vector<1x2x1x16xf32>
    %60 = vector.broadcast %59 : vector<1x2x1x16xf32> to vector<4x2x16x16xf32>
    %61 = arith.addf %57, %60 : vector<4x2x16x16xf32>
    %cst_15 = arith.constant dense<0xFF800000> : vector<4x2x16xf32>
    %62 = vector.multi_reduction <maximumf>, %61, %cst_15 [3] : vector<4x2x16x16xf32> to vector<4x2x16xf32>
    %63 = vector.shape_cast %62 : vector<4x2x16xf32> to vector<4x2x16x1xf32>
    %64 = vector.broadcast %63 : vector<4x2x16x1xf32> to vector<4x2x16x16xf32>
    %65 = arith.subf %61, %64 : vector<4x2x16x16xf32>
    %66 = math.exp %65 : vector<4x2x16x16xf32>
    %cst_16 = arith.constant dense<0.000000e+00> : vector<4x2x16xf32>
    %67 = vector.multi_reduction <add>, %66, %cst_16 [3] : vector<4x2x16x16xf32> to vector<4x2x16xf32>
    %68 = vector.shape_cast %67 : vector<4x2x16xf32> to vector<4x2x16x1xf32>
    %69 = tpu.reciprocal %68 {approx = true} : vector<4x2x16x1xf32> -> vector<4x2x16x1xf32>
    %70 = vector.broadcast %69 : vector<4x2x16x1xf32> to vector<4x2x16x16xf32>
    %71 = arith.mulf %66, %70 : vector<4x2x16x16xf32>
    %72 = vector.shape_cast %71 : vector<4x2x16x16xf32> to vector<8x16x16xf32>
    "tpu.trace_start"() <{level = 10 : i32, message = "gqk,gkd->gqd"}> : () -> ()
    %cst_17 = arith.constant dense<0.000000e+00> : vector<8x16x128xf32>
    %73 = tpu.matmul %72, %53, %cst_17 {dimension_numbers = #tpu.dot_dimension_numbers<[2], [1], [1], [2], [0, 0, 0, 1, 1, 2], [0], [0]>} : vector<8x16x16xf32>, vector<8x16x128xf32>, vector<8x16x128xf32> -> vector<8x16x128xf32>
    "tpu.trace_stop"() : () -> ()
    %74 = vector.shape_cast %73 : vector<8x16x128xf32> to vector<4x2x16x128xf32>
    %75 = vector.broadcast %40 : vector<4x1x1x128xf32> to vector<4x2x16x128xf32>
    %76 = arith.mulf %74, %75 : vector<4x2x16x128xf32>
    %cst_18 = arith.constant dense<0.000000e+00> : vector<2x16x128xf32>
    %77 = vector.multi_reduction <add>, %76, %cst_18 [0] : vector<4x2x16x128xf32> to vector<2x16x128xf32>
    %78 = vector.shape_cast %77 : vector<2x16x128xf32> to vector<32x128xf32>
    %79 = arith.truncf %78 : vector<32x128xf32> to vector<32x128xbf16>
    %c0_19 = arith.constant 0 : index
    %c0_20 = arith.constant 0 : index
    %c0_21 = arith.constant 0 : index
    %80 = vector.load %arg7[%c0_19, %c0_20, %c0_21] : memref<1x128x128xbf16, #tpu.memory_space<vmem>>, vector<1x128x128xbf16>
    %81 = vector.shape_cast %80 : vector<1x128x128xbf16> to vector<128x128xbf16>
    %cst_22 = arith.constant dense<0.000000e+00> : vector<32x128xf32>
    %82 = tpu.matmul %79, %81, %cst_22 {dimension_numbers = #tpu.dot_dimension_numbers<[1], [0], [0], [1], [0, 0, 1, 1], [], []>} : vector<32x128xbf16>, vector<128x128xbf16>, vector<32x128xf32> -> vector<32x128xf32>
    %83 = vector.broadcast %7 : vector<1x128xf32> to vector<32x128xf32>
    %84 = arith.addf %82, %83 : vector<32x128xf32>
    %85 = arith.addf %84, %3 : vector<32x128xf32>
    %cst_23 = arith.constant dense<0.000000e+00> : vector<32xf32>
    %86 = vector.multi_reduction <add>, %85, %cst_23 [1] : vector<32x128xf32> to vector<32xf32>
    %87 = vector.shape_cast %86 : vector<32xf32> to vector<32x1xf32>
    %cst_24 = arith.constant 1.280000e+02 : f32
    %88 = vector.broadcast %cst_24 : f32 to vector<32x1xf32>
    %89 = arith.divf %87, %88 : vector<32x1xf32>
    %90 = vector.broadcast %89 : vector<32x1xf32> to vector<32x128xf32>
    %91 = arith.subf %85, %90 : vector<32x128xf32>
    %92 = arith.mulf %91, %91 : vector<32x128xf32>
    %cst_25 = arith.constant dense<0.000000e+00> : vector<32xf32>
    %93 = vector.multi_reduction <add>, %92, %cst_25 [1] : vector<32x128xf32> to vector<32xf32>
    %94 = vector.shape_cast %93 : vector<32xf32> to vector<32x1xf32>
    %cst_26 = arith.constant 1.280000e+02 : f32
    %95 = vector.broadcast %cst_26 : f32 to vector<32x1xf32>
    %96 = arith.divf %94, %95 : vector<32x1xf32>
    %cst_27 = arith.constant 9.99999996E-13 : f32
    %97 = vector.broadcast %cst_27 : f32 to vector<32x1xf32>
    %98 = arith.addf %96, %97 : vector<32x1xf32>
    %99 = math.rsqrt %98 : vector<32x1xf32>
    %100 = vector.broadcast %99 : vector<32x1xf32> to vector<32x128xf32>
    %101 = arith.mulf %91, %100 : vector<32x128xf32>
    %102 = vector.broadcast %8 : vector<1x128xf32> to vector<32x128xf32>
    %103 = arith.mulf %101, %102 : vector<32x128xf32>
    %104 = vector.broadcast %9 : vector<1x128xf32> to vector<32x128xf32>
    %105 = arith.addf %103, %104 : vector<32x128xf32>
    %106 = arith.truncf %105 : vector<32x128xf32> to vector<32x128xbf16>
    %c0_28 = arith.constant 0 : index
    %c0_29 = arith.constant 0 : index
    %c0_30 = arith.constant 0 : index
    %107 = vector.load %arg8[%c0_28, %c0_29, %c0_30] : memref<1x128x256xbf16, #tpu.memory_space<vmem>>, vector<1x128x256xbf16>
    %108 = vector.shape_cast %107 : vector<1x128x256xbf16> to vector<128x256xbf16>
    %cst_31 = arith.constant dense<0.000000e+00> : vector<32x256xf32>
    %109 = tpu.matmul %106, %108, %cst_31 {dimension_numbers = #tpu.dot_dimension_numbers<[1], [0], [0], [1], [0, 0, 1, 1], [], []>} : vector<32x128xbf16>, vector<128x256xbf16>, vector<32x256xf32> -> vector<32x256xf32>
    %110 = vector.broadcast %10 : vector<1x256xf32> to vector<32x256xf32>
    %111 = arith.addf %109, %110 : vector<32x256xf32>
    %cst_32 = arith.constant 5.000000e-01 : f32
    %112 = vector.broadcast %cst_32 : f32 to vector<32x256xf32>
    %113 = arith.mulf %112, %111 : vector<32x256xf32>
    %cst_33 = arith.constant 4.471500e-02 : f32
    %114 = vector.broadcast %cst_33 : f32 to vector<32x256xf32>
    %115 = arith.mulf %114, %111 : vector<32x256xf32>
    %116 = arith.mulf %115, %111 : vector<32x256xf32>
    %117 = arith.mulf %116, %111 : vector<32x256xf32>
    %118 = arith.addf %111, %117 : vector<32x256xf32>
    %cst_34 = arith.constant 0.797884583 : f32
    %119 = vector.broadcast %cst_34 : f32 to vector<32x256xf32>
    %120 = arith.mulf %119, %118 : vector<32x256xf32>
    %121 = math.tanh %120 : vector<32x256xf32>
    %cst_35 = arith.constant 1.000000e+00 : f32
    %122 = vector.broadcast %cst_35 : f32 to vector<32x256xf32>
    %123 = arith.addf %122, %121 : vector<32x256xf32>
    %124 = arith.mulf %113, %123 : vector<32x256xf32>
    %125 = arith.truncf %124 : vector<32x256xf32> to vector<32x256xbf16>
    %c0_36 = arith.constant 0 : index
    %c0_37 = arith.constant 0 : index
    %c0_38 = arith.constant 0 : index
    %126 = vector.load %arg9[%c0_36, %c0_37, %c0_38] : memref<1x256x128xbf16, #tpu.memory_space<vmem>>, vector<1x256x128xbf16>
    %127 = vector.shape_cast %126 : vector<1x256x128xbf16> to vector<256x128xbf16>
    %cst_39 = arith.constant dense<0.000000e+00> : vector<32x128xf32>
    %128 = tpu.matmul %125, %127, %cst_39 {dimension_numbers = #tpu.dot_dimension_numbers<[1], [0], [0], [1], [0, 0, 1, 1], [], []>} : vector<32x256xbf16>, vector<256x128xbf16>, vector<32x128xf32> -> vector<32x128xf32>
    %129 = vector.broadcast %11 : vector<1x128xf32> to vector<32x128xf32>
    %130 = arith.addf %128, %129 : vector<32x128xf32>
    %131 = arith.addf %130, %105 : vector<32x128xf32>
    %cst_40 = arith.constant dense<0.000000e+00> : vector<32xf32>
    %132 = vector.multi_reduction <add>, %131, %cst_40 [1] : vector<32x128xf32> to vector<32xf32>
    %133 = vector.shape_cast %132 : vector<32xf32> to vector<32x1xf32>
    %cst_41 = arith.constant 1.280000e+02 : f32
    %134 = vector.broadcast %cst_41 : f32 to vector<32x1xf32>
    %135 = arith.divf %133, %134 : vector<32x1xf32>
    %136 = vector.broadcast %135 : vector<32x1xf32> to vector<32x128xf32>
    %137 = arith.subf %131, %136 : vector<32x128xf32>
    %138 = arith.mulf %137, %137 : vector<32x128xf32>
    %cst_42 = arith.constant dense<0.000000e+00> : vector<32xf32>
    %139 = vector.multi_reduction <add>, %138, %cst_42 [1] : vector<32x128xf32> to vector<32xf32>
    %140 = vector.shape_cast %139 : vector<32xf32> to vector<32x1xf32>
    %cst_43 = arith.constant 1.280000e+02 : f32
    %141 = vector.broadcast %cst_43 : f32 to vector<32x1xf32>
    %142 = arith.divf %140, %141 : vector<32x1xf32>
    %cst_44 = arith.constant 9.99999996E-13 : f32
    %143 = vector.broadcast %cst_44 : f32 to vector<32x1xf32>
    %144 = arith.addf %142, %143 : vector<32x1xf32>
    %145 = math.rsqrt %144 : vector<32x1xf32>
    %146 = vector.broadcast %145 : vector<32x1xf32> to vector<32x128xf32>
    %147 = arith.mulf %137, %146 : vector<32x128xf32>
    %148 = vector.broadcast %12 : vector<1x128xf32> to vector<32x128xf32>
    %149 = arith.mulf %147, %148 : vector<32x128xf32>
    %150 = vector.broadcast %13 : vector<1x128xf32> to vector<32x128xf32>
    %151 = arith.addf %149, %150 : vector<32x128xf32>
    %c0_45 = arith.constant 0 : index
    %c0_46 = arith.constant 0 : index
    %152 = vector.load %arg14[%c0_45, %c0_46] : memref<32x128xf32, #tpu.memory_space<vmem>>, vector<32x128xf32>
    tpu.vector_store %arg14[%c0_45, %c0_46], %151 {strides = array<i32>} : memref<32x128xf32, #tpu.memory_space<vmem>>, vector<32x128xf32>,
    %c1_i32_47 = arith.constant 1 : i32
    %153 = arith.cmpi eq, %arg0, %c1_i32_47 : i32
    %154 = arith.extui %153 : i1 to i32
    %c0_i32_48 = arith.constant 0 : i32
    %155 = arith.cmpi ne, %154, %c0_i32_48 : i32
    scf.if %155 {
      %c0_49 = arith.constant 0 : index
      %c0_50 = arith.constant 0 : index
      %156 = tpu.strided_load %arg14[%c0_49, %c0_50] {strides = array<i32: 16, 1>} : memref<32x128xf32, #tpu.memory_space<vmem>>, vector<2x128xf32>
      %157 = arith.truncf %156 : vector<2x128xf32> to vector<2x128xbf16>
      %c0_51 = arith.constant 0 : index
      %c0_52 = arith.constant 0 : index
      %158 = vector.load %arg11[%c0_51, %c0_52] : memref<128x128xbf16, #tpu.memory_space<vmem>>, vector<128x128xbf16>
      %cst_53 = arith.constant dense<0.000000e+00> : vector<2x128xf32>
      %159 = tpu.matmul %157, %158, %cst_53 {dimension_numbers = #tpu.dot_dimension_numbers<[1], [0], [0], [1], [0, 0, 1, 1], [], []>} : vector<2x128xbf16>, vector<128x128xbf16>, vector<2x128xf32> -> vector<2x128xf32>
      %c0_54 = arith.constant 0 : index
      %c0_55 = arith.constant 0 : index
      %160 = vector.load %arg12[%c0_54, %c0_55] : memref<1x128xf32, #tpu.memory_space<vmem>>, vector<1x128xf32>
      %161 = vector.broadcast %160 : vector<1x128xf32> to vector<2x128xf32>
      %162 = arith.addf %159, %161 : vector<2x128xf32>
      %163 = math.tanh %162 : vector<2x128xf32>
      %c0_56 = arith.constant 0 : index
      %c0_57 = arith.constant 0 : index
      %164 = vector.load %arg13[%c0_56, %c0_57] : memref<2x128xf32, #tpu.memory_space<vmem>>, vector<2x128xf32>
      tpu.vector_store %arg13[%c0_56, %c0_57], %163 {strides = array<i32>} : memref<2x128xf32, #tpu.memory_space<vmem>>, vector<2x128xf32>,
    } else {
    }
    return
  }
  func.func @transform_0(%arg0: i32) -> (i32, i32) {
    %c0_i32 = arith.constant 0 : i32
    %c0_i32_0 = arith.constant 0 : i32
    %c0_i32_1 = arith.constant 0 : i32
    return %c0_i32, %c0_i32_0 : i32, i32
  }
  func.func @transform_1(%arg0: i32) -> (i32, i32) {
    %c0_i32 = arith.constant 0 : i32
    %c0_i32_0 = arith.constant 0 : i32
    %c0_i32_1 = arith.constant 0 : i32
    return %c0_i32, %c0_i32_0 : i32, i32
  }
  func.func @transform_2(%arg0: i32) -> (i32, i32) {
    %c0_i32 = arith.constant 0 : i32
    %c0_i32_0 = arith.constant 0 : i32
    %c0_i32_1 = arith.constant 0 : i32
    return %c0_i32, %c0_i32_0 : i32, i32
  }
  func.func @transform_3(%arg0: i32) -> (i32, i32) {
    %c0_i32 = arith.constant 0 : i32
    %c0_i32_0 = arith.constant 0 : i32
    %c0_i32_1 = arith.constant 0 : i32
    return %c0_i32, %c0_i32_0 : i32, i32
  }
  func.func @transform_4(%arg0: i32) -> (i32, i32) {
    %c0_i32 = arith.constant 0 : i32
    %c0_i32_0 = arith.constant 0 : i32
    %c0_i32_1 = arith.constant 0 : i32
    return %c0_i32, %c0_i32_0 : i32, i32
  }
  func.func @transform_5(%arg0: i32) -> (i32, i32, i32) {
    %c0_i32 = arith.constant 0 : i32
    %c0_i32_0 = arith.constant 0 : i32
    %c0_i32_1 = arith.constant 0 : i32
    return %arg0, %c0_i32, %c0_i32_0 : i32, i32, i32
  }
  func.func @transform_6(%arg0: i32) -> (i32, i32, i32) {
    %c0_i32 = arith.constant 0 : i32
    %c0_i32_0 = arith.constant 0 : i32
    %c0_i32_1 = arith.constant 0 : i32
    return %arg0, %c0_i32, %c0_i32_0 : i32, i32, i32
  }
  func.func @transform_7(%arg0: i32) -> (i32, i32, i32) {
    %c0_i32 = arith.constant 0 : i32
    %c0_i32_0 = arith.constant 0 : i32
    %c0_i32_1 = arith.constant 0 : i32
    return %arg0, %c0_i32, %c0_i32_0 : i32, i32, i32
  }
  func.func @transform_8(%arg0: i32) -> (i32, i32, i32) {
    %c0_i32 = arith.constant 0 : i32
    %c0_i32_0 = arith.constant 0 : i32
    %c0_i32_1 = arith.constant 0 : i32
    return %arg0, %c0_i32, %c0_i32_0 : i32, i32, i32
  }
  func.func @transform_9(%arg0: i32) -> (i32, i32, i32) {
    %c0_i32 = arith.constant 0 : i32
    %c0_i32_0 = arith.constant 0 : i32
    %c0_i32_1 = arith.constant 0 : i32
    return %arg0, %c0_i32, %c0_i32_0 : i32, i32, i32
  }
  func.func @transform_10(%arg0: i32) -> (i32, i32) {
    %c0_i32 = arith.constant 0 : i32
    %c0_i32_0 = arith.constant 0 : i32
    %c0_i32_1 = arith.constant 0 : i32
    return %c0_i32, %c0_i32_0 : i32, i32
  }
  func.func @transform_11(%arg0: i32) -> (i32, i32) {
    %c0_i32 = arith.constant 0 : i32
    %c0_i32_0 = arith.constant 0 : i32
    %c0_i32_1 = arith.constant 0 : i32
    return %c0_i32, %c0_i32_0 : i32, i32
  }
  func.func @transform_12(%arg0: i32) -> (i32, i32) {
    %c0_i32 = arith.constant 0 : i32
    %c0_i32_0 = arith.constant 0 : i32
    %c0_i32_1 = arith.constant 0 : i32
    return %c0_i32, %c0_i32_0 : i32, i32
  }
}

</mosaic_0001>

<bundles_post_ra>
// kernel: bert_pooler_output.1
= control target key start
LH: loop header
LB: loop body
LE: loop exit
PB: predicated region body
PF: predicated region fallthrough
CT: control target
= control target key end

     0   :  { %s5908_s0 = inlined_call_operand.vmem [shape: s32[32,1], index: 0, kind: input, shape index: {}]   ;;  %s5909_s1 = inlined_call_operand.vmem [shape: s32[2,16], index: 1, kind: input, shape index: {}]   ;;  %s5910_s2 = inlined_call_operand.hbm [shape: f32[128,128], index: 2, kind: input, shape index: {}]   ;;  %s5911_s3 = inlined_call_operand.hbm [shape: f32[16,128], index: 3, kind: input, shape index: {}]   ;;  %s5912_s4 = inlined_call_operand.hbm [shape: f32[2,128], index: 4, kind: input, shape index: {}]   ;;  %s5913_s5 = inlined_call_operand.hbm [shape: bf16[2,128,384], index: 5, kind: input, shape index: {}]   ;;  %s5914_s6 = inlined_call_operand.hbm [shape: bf16[2,128,128], index: 6, kind: input, shape index: {}]   ;;  %s5915_s7 = inlined_call_operand.hbm [shape: bf16[2,128,256], index: 7, kind: input, shape index: {}]   ;;  %s5916_s8 = inlined_call_operand.hbm [shape: bf16[2,256,128], index: 8, kind: input, shape index: {}]   ;;  %s5917_s9 = inlined_call_operand.vmem [shape: f32[2,8,384], index: 9, kind: input, shape index: {}]   ;;  %s5918_s10 = inlined_call_operand.hbm [shape: bf16[128,128], index: 10, kind: input, shape index: {}]   ;;  %s5919_s11 = inlined_call_operand.hbm [shape: f32[1,128], index: 11, kind: input, shape index: {}]   ;;  %s5920_s12 = inlined_call_operand.hbm [shape: f32[2,128], index: 12, kind: output, shape index: {}]  }
   0x1   :  { %5953 = sst [smem:[#allocation32_spill]] %s5908_s0 }
   0x2   :  { %5954 = sst [smem:[#allocation33_spill]] %s5909_s1 }
   0x3   :  { %5955 = sst [smem:[#allocation34_spill]] %s5911_s3 }
   0x4   :  { %5956 = sst [smem:[#allocation35_spill]] %s5913_s5 }
   0x5   :  { %5957 = sst [smem:[#allocation36_spill]] %s5915_s7 }
   0x6   :  { %5958 = sst [smem:[#allocation37_spill]] %s5917_s9 }
   0x7   :  { %5959 = sst [smem:[#allocation38_spill]] %s5918_s10 }
   0x8   :  { %5960 = sst [smem:[#allocation39_spill]] %s5920_s12 }
   0x9   :  { %17 = vsyncpa [#allocation5], 0 }
   0xa   :  { %18 = vsyncpa [#allocation8], 0 }
   0xb   :  { %19 = vsyncpa [#allocation11], 0 }
   0xc   :  { %21 = vsyncpa [#allocation11 + $0x1], 0 }
   0xd   :  { %22 = vsyncpa [#allocation14], 0 }
   0xe   :  { %24 = vsyncpa [#allocation14 + $0x1], 0 }
   0xf   :  { %25 = vsyncpa [#allocation17], 0 }
  0x10   :  { %26 = vsyncpa [#allocation6], 0  ;;  %s5035_s21 = smov 0   ;;  %s5037_s22 = smov 0  }
  0x11   :  { %s5039_s23 = smov 0   ;;  %s5041_s24 = smov 0  }
  0x12 LB: > { %5961 = sst [smem:[#allocation26_spill]] %s4937_s22  ;;  %s5056_s25 = sadd.s32 4294967295, %s4945_s24   ;;  %s4945_s24 = sphi %s5041_s24, %s6006_s24   ;;  %s4941_s23 = sphi %s5039_s23, %s6009_s23   ;;  %s4937_s22 = sphi %s5037_s22, %s6008_s22   ;;  %s4933_s21 = sphi %s5035_s21, %s6007_s21  }
  0x13   : > { %5962 = sst [smem:[#allocation27_spill]] %s4941_s23  ;;  %p3678_p0 = scmp.ge.s32.totalorder %s4945_s24, 1 }
  0x14   : > { %5963 = sst [smem:[#allocation28_spill]] %s5056_s25  ;;  %p5921_p1 = scmp.eq.s32.totalorder %s5056_s25, 0 }
  0x15   : > { %p335_p2 = scmp.lt.s32.totalorder %s4945_s24, 3  ;;  %s4947_s27 = smov [#allocation7]  }
  0x16   : > { %s366_s28 = sshll.u32 %s4947_s27, 4  ;;  %s4948_s29 = smov [#allocation16]   ;;  %s367_s28 = int_to_ptr.vmem [resolvable:$true] %s366_s28 }
  0x17   : > { %p5062_p4 = pnand %p3678_p0, %p335_p2  ;;  %s390_s30 = sshll.u32 %s4948_s29, 4  ;;  %s5074_s30 = int_to_ptr.vmem [resolvable:$true] %s390_s30 }
  0x18   : > { %s5966_s3 = sld [smem:[#allocation34_spill]] }
  0x19   : > { %s5964_s26 = scalar_select %p5062_p4, 1, 0 }
  0x1a   : > { %p4310_p5 = pneg %p5062_p4 }
  0x1c   : > { %p5070_p6 = pnand %p4310_p5, %p5921_p1 }
  0x1e   : > { %s5965_s13 = scalar_select %p5070_p6, 1, 0 }
  0x1f   : > { %s4605_s16 = scalar_lea.hbm %s5966_s3, 256  ;;  %p5084_p8 = pneg %p5070_p6 }
  0x20   : > { %p4606_p7 = scmp.ne.s32.totalorder %s5966_s3, %s4605_s16  ;;  %p4612_p11 = scmp.lt.u32.totalorder %s4605_s16, %s5966_s3 }
  0x21   : > { %s5967_s19 = scalar_select %p5084_p8, 1, 0 }
  0x22   : > { %p4608_p9 = pnand %p5084_p8, %p4606_p7 }
  0x24   : > { %p4609_p10 = pneg %p4608_p9 }
  0x26   : > { %p4614_p12 = pnand %p4612_p11, %p4609_p10 }
  0x28   : > { %4617 = shalt.err (!%p4614_p12)
}
  0x29   : > { %s4618_s29 = scalar_lea.vmem %s367_s28, 256  ;;  %p4626_p5 = scmp.lt.s32.totalorder %s367_s28, %s367_s28 }
  0x2a   : > { %p4619_p13 = scmp.ne.s32.totalorder %s367_s28, %s4618_s29  ;;  %p4627_p3 = scmp.lt.s32.totalorder %s4618_s29, %s4618_s29 }
  0x2c   : > { %p4621_p0 = pnand %p4619_p13, %p5084_p8  ;;  %p4628_p1 = por %p4627_p3, %p4626_p5 }
  0x2e   : > { %p4622_p2 = pneg %p4621_p0 }
  0x30   : > { %p4629_p4 = pnand %p4628_p1, %p4622_p2 }
  0x32   : > { %4632 = shalt.err (!%p4629_p4)
}
  0x33   : > { %s5929_s14 = smov 128   ;;  %s5931_s15 = smov 8  }
  0x34   : > { %4316 = dma.hbm_to_vmem [thread:$0]  (!%p5070_p6), %s5966_s3, 256, %s367_s28, [#allocation8], %s5929_s14, %s5929_s14, %s5931_s15  }
  0x35   : > { %s5968_s10 = sld [smem:[#allocation38_spill]] }
  0x3b   : > { %s4633_s27 = scalar_lea.hbm %s5968_s10, 1024 }
  0x3c   : > { %p4634_p1 = scmp.ne.s32.totalorder %s5968_s10, %s4633_s27  ;;  %p4640_p7 = scmp.lt.u32.totalorder %s4633_s27, %s5968_s10 }
  0x3e   : > { %p4636_p3 = pnand %p4634_p1, %p5084_p8 }
  0x40   : > { %p4637_p4 = pneg %p4636_p3 }
  0x42   : > { %p4642_p9 = pnand %p4640_p7, %p4637_p4 }
  0x44   : > { %4645 = shalt.err (!%p4642_p9)
}
  0x45   : > { %s4646_s28 = scalar_lea.vmem %s5074_s30, 1024  ;;  %p4654_p13 = scmp.lt.s32.totalorder %s5074_s30, %s5074_s30 }
  0x46   : > { %p4647_p10 = scmp.ne.s32.totalorder %s5074_s30, %s4646_s28  ;;  %p4655_p0 = scmp.lt.s32.totalorder %s4646_s28, %s4646_s28 }
  0x48   : > { %p4649_p11 = pnand %p4647_p10, %p5084_p8  ;;  %p4656_p2 = por %p4655_p0, %p4654_p13 }
  0x4a   : > { %p4650_p12 = pneg %p4649_p11 }
  0x4c   : > { %p4657_p5 = pnand %p4656_p2, %p4650_p12 }
  0x4e   : > { %4660 = shalt.err (!%p4657_p5)
}
  0x4f   : > { %s5925_s12 = smov 64   ;;  %s5927_s0 = smov 4  }
  0x50   : > { %4322 = dma.hbm_to_vmem [thread:$0]  (!%p5070_p6), %s5968_s10, 1024, %s5074_s30, [#allocation17], %s5925_s12, %s5925_s12, %s5927_s0  }
  0x51   : > { %s5130_s17 = sadd.s32 1, %s4945_s24   ;;  %s144_s18 = sadd.s32 1, %s4941_s23 }
  0x52   : > { %5969 = sst [smem:[#allocation29_spill]] %s5130_s17  ;;  %s141_s20 = ssub.s32 %s4945_s24, %s5130_s17 }
  0x53   : > { %p151_p1 = scmp.ne.s32.totalorder %s4941_s23, %s4937_s22  ;;  %p142_p3 = scmp.eq.s32.totalorder %s141_s20, 0 }
  0x54   : > { %p152_p4 = scmp.eq.s32.totalorder %s4945_s24, 0  ;;  %p157_p7 = scmp.ne.s32.totalorder %s4937_s22, %s4933_s21 }
  0x55   : > { %p4344_p9 = scmp.lt.s32.totalorder %s4945_s24, 2  ;;  %p5971_p11 = scmp.eq.s32.totalorder %s5056_s25, 0 }
  0x56   : > { %s5142_s27 = scalar_select %p142_p3, %s4941_s23, %s144_s18  }
  0x57   : > { %p153_p10 = por %p152_p4, %p151_p1  ;;  %p5146_p12 = por %p5971_p11, %p157_p7 }
  0x58   : > { %5970 = sst [smem:[#allocation30_spill]] %s5142_s27  ;;  %s5933_s30 = sand.u32 1, %s4945_s24  }
  0x59   : > { %s5972_s29 = scalar_select %p5146_p12, 1, 0 }
  0x5a   : > { %s5152_s28 = sand.u32 1, %s4941_s23   ;;  %s4275_s16 = smul.u32 3072, %s4945_s24 }
  0x5b   : > { %5973 = sst [smem:[#allocation31_spill]] %s5972_s29  ;;  %s4274_s1 = smul.u32 192, %s5152_s28 }
  0x5c   : > { %p5156_p13 = pnand %p4344_p9, %p153_p10  ;;  %s5975_s5 = sld [smem:[#allocation35_spill]] }
  0x5d   : > { %s419_s0 = scalar_lea.vmem [#allocation10], %s4274_s1  ;;  %s5169_s15 = scalar_lea.sflag [#allocation11], %s5933_s30 }
  0x5e   : > { %s5974_s20 = scalar_select %p5156_p13, 1, 0 }
  0x5f   : > { %s426_s14 = sshll.u32 %s419_s0, 4  ;;  %p5175_p2 = pneg %p5156_p13  ;;  %s5165_s14 = int_to_ptr.vmem [resolvable:$true] %s426_s14 }
  0x61   : > { %s5976_s10 = scalar_select %p5175_p2, 1, 0 }
  0x62   : > { %s5163_s18 = scalar_lea.hbm %s5975_s5, %s4275_s16  ;;  %s4666_s0 = scalar_lea.hbm %s5975_s5, 6144 }
  0x63   : > { %s4661_s3 = scalar_lea.hbm %s5163_s18, 3072  ;;  %p4667_p3 = scmp.lt.u32.totalorder %s5163_s18, %s5975_s5 }
  0x64   : > { %p4662_p0 = scmp.ne.s32.totalorder %s5163_s18, %s4661_s3  ;;  %p4668_p4 = scmp.lt.u32.totalorder %s4666_s0, %s4661_s3 }
  0x65   : > { %p4670_p9 = scmp.lt.u32.totalorder %s4661_s3, %s5163_s18 }
  0x66   : > { %p4664_p5 = pnand %p5175_p2, %p4662_p0  ;;  %p4669_p7 = por %p4668_p4, %p4667_p3 }
  0x68   : > { %p4665_p1 = pneg %p4664_p5  ;;  %p4671_p10 = por %p4670_p9, %p4669_p7 }
  0x6a   : > { %p4672_p11 = pnand %p4671_p10, %p4665_p1 }
  0x6c   : > { %4675 = shalt.err (!%p4672_p11)
}
  0x6d   : > { %s4676_s30 = scalar_lea.vmem %s5165_s14, 3072  ;;  %s4953_s12 = smov [#allocation10]  }
  0x6e   : > { %p4677_p0 = scmp.ne.s32.totalorder %s5165_s14, %s4676_s30  ;;  %s4681_s16 = sshll.u32 %s4953_s12, 4  ;;  %s4682_s16 = int_to_ptr.vmem [resolvable:$false] %s4681_s16 }
  0x6f   : > { %s4683_s1 = scalar_lea.vmem %s4682_s16, 6144  ;;  %p4684_p6 = scmp.lt.s32.totalorder %s5165_s14, %s4682_s16 }
  0x70   : > { %p4679_p5 = pnand %p4677_p0, %p5175_p2  ;;  %p4685_p8 = scmp.lt.s32.totalorder %s4683_s1, %s4676_s30 }
  0x72   : > { %p4680_p12 = pneg %p4679_p5  ;;  %p4686_p3 = por %p4685_p8, %p4684_p6 }
  0x74   : > { %p4687_p4 = pnand %p4686_p3, %p4680_p12 }
  0x76   : > { %4690 = shalt.err (!%p4687_p4)
}
  0x77   : > { %s4954_s3 = smov 192   ;;  %s4955_s0 = smov 12  }
  0x78   : > { %4329 = dma.hbm_to_vmem [thread:$0]  (!%p5156_p13), %s5163_s18, 3072, %s5165_s14, %s5169_s15, %s4954_s3, %s4954_s3, %s4955_s0  }
  0x79   : > { %s5942_s21 = sshll.u32 %s5152_s28, 7  ;;  %s3809_s12 = sshll.u32 %s4945_s24, 11 }
  0x7a   : > { %s5977_s7 = sld [smem:[#allocation36_spill]]  ;;  %s461_s5 = scalar_lea.vmem [#allocation13], %s5942_s21 }
  0x7b   : > { %s468_s27 = sshll.u32 %s461_s5, 4  ;;  %s5213_s14 = scalar_lea.hbm %s5916_s8, %s3809_s12  ;;  %s5208_s27 = int_to_ptr.vmem [resolvable:$true] %s468_s27 }
  0x7c   : > { %s5978_s18 = sand.u32 1, %s4945_s24  }
  0x7d   : > { %s5217_s3 = scalar_lea.sflag [#allocation14], %s5978_s18 }
  0x80   : > { %s5204_s1 = scalar_lea.hbm %s5977_s7, %s3809_s12  ;;  %s4696_s21 = scalar_lea.hbm %s5977_s7, 4096 }
  0x81   : > { %s4691_s0 = scalar_lea.hbm %s5204_s1, 2048  ;;  %p4697_p1 = scmp.lt.u32.totalorder %s5204_s1, %s5977_s7 }
  0x82   : > { %p4692_p6 = scmp.ne.s32.totalorder %s5204_s1, %s4691_s0  ;;  %p4698_p7 = scmp.lt.u32.totalorder %s4696_s21, %s4691_s0 }
  0x83   : > { %p4700_p10 = scmp.lt.u32.totalorder %s4691_s0, %s5204_s1 }
  0x84   : > { %p4694_p8 = pnand %p4692_p6, %p5175_p2  ;;  %p4699_p9 = por %p4698_p7, %p4697_p1 }
  0x86   : > { %p4695_p12 = pneg %p4694_p8  ;;  %p4701_p11 = por %p4700_p10, %p4699_p9 }
  0x88   : > { %p4702_p0 = pnand %p4701_p11, %p4695_p12 }
  0x8a   : > { %4705 = shalt.err (!%p4702_p0)
}
  0x8b   : > { %s4706_s23 = scalar_lea.vmem %s5208_s27, 2048  ;;  %s4956_s17 = smov [#allocation13]  }
  0x8c   : > { %p4707_p5 = scmp.ne.s32.totalorder %s5208_s27, %s4706_s23  ;;  %s4711_s12 = sshll.u32 %s4956_s17, 4  ;;  %s4712_s12 = int_to_ptr.vmem [resolvable:$false] %s4711_s12 }
  0x8d   : > { %s4713_s9 = scalar_lea.vmem %s4712_s12, 4096  ;;  %p4714_p6 = scmp.lt.s32.totalorder %s5208_s27, %s4712_s12 }
  0x8e   : > { %p4709_p3 = pnand %p4707_p5, %p5175_p2  ;;  %p4715_p8 = scmp.lt.s32.totalorder %s4713_s9, %s4706_s23 }
  0x90   : > { %p4710_p4 = pneg %p4709_p3  ;;  %p4716_p1 = por %p4715_p8, %p4714_p6 }
  0x92   : > { %p4717_p7 = pnand %p4716_p1, %p4710_p4 }
  0x94   : > { %4720 = shalt.err (!%p4717_p7)
}
  0x95   : > { %s5979_s21 = smov 8   ;;  %s5980_s18 = smov 128  }
  0x96   : > { %4335 = dma.hbm_to_vmem [thread:$0]  (!%p5156_p13), %s5204_s1, 2048, %s5208_s27, %s5217_s3, %s5980_s18, %s5980_s18, %s5979_s21  }
  0x97   : > { %s5981_s0 = sshll.u32 %s5152_s28, 7  ;;  %s4957_s5 = smov [#allocation4]  }
  0x98   : > { %s482_s16 = scalar_lea.vmem [#allocation15], %s5981_s0  ;;  %s353_s23 = sshll.u32 %s4957_s5, 4  ;;  %s354_s23 = int_to_ptr.vmem [resolvable:$true] %s353_s23 }
  0x99   : > { %s489_s30 = sshll.u32 %s482_s16, 4  ;;  %s4721_s9 = scalar_lea.hbm %s5910_s2, 2048  ;;  %s5246_s30 = int_to_ptr.vmem [resolvable:$true] %s489_s30 }
  0x9a   : > { %p4722_p12 = scmp.ne.s32.totalorder %s5910_s2, %s4721_s9  ;;  %p5982_p9 = scmp.ne.s32.totalorder %s5967_s19, 0 }
  0x9b   : > { %p4728_p0 = scmp.lt.u32.totalorder %s4721_s9, %s5910_s2 }
  0x9c   : > { %p4724_p10 = pnand %p4722_p12, %p5982_p9 }
  0x9e   : > { %p4725_p11 = pneg %p4724_p10 }
  0xa0   : > { %p4730_p5 = pnand %p4728_p0, %p4725_p11 }
  0xa2   : > { %4733 = shalt.err (!%p4730_p5)
}
  0xa3   : > { %s4734_s0 = scalar_lea.vmem %s354_s23, 2048  ;;  %p4742_p8 = scmp.lt.s32.totalorder %s354_s23, %s354_s23 }
  0xa4   : > { %p4735_p3 = scmp.ne.s32.totalorder %s354_s23, %s4734_s0  ;;  %p4743_p1 = scmp.lt.s32.totalorder %s4734_s0, %s4734_s0 }
  0xa6   : > { %p4737_p4 = pnand %p4735_p3, %p5982_p9  ;;  %p4744_p7 = por %p4743_p1, %p4742_p8 }
  0xa8   : > { %p4738_p6 = pneg %p4737_p4 }
  0xaa   : > { %p4745_p13 = pnand %p4744_p7, %p4738_p6 }
  0xac   : > { %4748 = shalt.err (!%p4745_p13)
}
  0xad   : > { %p5983_p12 = scmp.ne.s32.totalorder %s5965_s13, 0  ;;  %s4958_s16 = smov [#allocation9]  }
  0xae   : > { %s380_s5 = sshll.u32 %s4958_s16, 4  ;;  %s4959_s17 = smov [#allocation18]   ;;  %s381_s5 = int_to_ptr.vmem [resolvable:$true] %s380_s5 }
  0xaf   : > { %4313 = dma.hbm_to_vmem [thread:$0]  (!%p5983_p12), %s5910_s2, 2048, %s354_s23, [#allocation5], %s5980_s18, %s5980_s18, %s5979_s21  }
  0xb0   : > { %s404_s12 = sshll.u32 %s4959_s17, 4  ;;  %s4749_s1 = scalar_lea.hbm %s5912_s4, 32  ;;  %s405_s12 = int_to_ptr.vmem [resolvable:$true] %s404_s12 }
  0xb1   : > { %p4750_p13 = scmp.ne.s32.totalorder %s5912_s4, %s4749_s1  ;;  %p4756_p0 = scmp.lt.u32.totalorder %s4749_s1, %s5912_s4 }
  0xb3   : > { %p4752_p10 = pnand %p4750_p13, %p5982_p9 }
  0xb5   : > { %p4753_p11 = pneg %p4752_p10 }
  0xb7   : > { %p4758_p5 = pnand %p4756_p0, %p4753_p11 }
  0xb9   : > { %4761 = shalt.err (!%p4758_p5)
}
  0xba   : > { %s4762_s21 = scalar_lea.vmem %s381_s5, 32  ;;  %p4770_p8 = scmp.lt.s32.totalorder %s381_s5, %s381_s5 }
  0xbb   : > { %p4763_p3 = scmp.ne.s32.totalorder %s381_s5, %s4762_s21  ;;  %p4771_p1 = scmp.lt.s32.totalorder %s4762_s21, %s4762_s21 }
  0xbd   : > { %p4765_p4 = pnand %p4763_p3, %p5982_p9  ;;  %p4772_p7 = por %p4771_p1, %p4770_p8 }
  0xbf   : > { %p4766_p6 = pneg %p4765_p4 }
  0xc1   : > { %p4773_p2 = pnand %p4772_p7, %p4766_p6 }
  0xc3   : > { %4776 = shalt.err (!%p4773_p2)
}
  0xc4   : > { %4319 = dma.hbm_to_vmem [thread:$0]  (!%p5983_p12), %s5912_s4, 32, %s381_s5, [#allocation8]  }
  0xc5   : > { %s3686_s25 = sshll.u32 %s5152_s28, 6  ;;  %s4777_s16 = scalar_lea.hbm %s5919_s11, 16 }
  0xc6   : > { %p4778_p13 = scmp.ne.s32.totalorder %s5919_s11, %s4777_s16  ;;  %p4784_p11 = scmp.lt.u32.totalorder %s4777_s16, %s5919_s11 }
  0xc8   : > { %p4780_p2 = pnand %p4778_p13, %p5982_p9 }
  0xca   : > { %p4781_p10 = pneg %p4780_p2 }
  0xcc   : > { %p4786_p0 = pnand %p4784_p11, %p4781_p10 }
  0xce   : > { %4789 = shalt.err (!%p4786_p0)
}
  0xcf   : > { %s4790_s5 = scalar_lea.vmem %s405_s12, 16  ;;  %s4797_s28 = scalar_lea.vmem %s405_s12, 32 }
  0xd0   : > { %p4791_p5 = scmp.ne.s32.totalorder %s405_s12, %s4790_s5  ;;  %p4798_p6 = scmp.lt.s32.totalorder %s405_s12, %s405_s12 }
  0xd1   : > { %p4799_p8 = scmp.lt.s32.totalorder %s4797_s28, %s4790_s5 }
  0xd2   : > { %p4793_p3 = pnand %p4791_p5, %p5982_p9 }
  0xd3   : > { %p4800_p1 = por %p4799_p8, %p4798_p6 }
  0xd4   : > { %p4794_p4 = pneg %p4793_p3 }
  0xd6   : > { %p4801_p7 = pnand %p4800_p1, %p4794_p4 }
  0xd8   : > { %4804 = shalt.err (!%p4801_p7)
}
  0xd9   : > { %4325 = dma.hbm_to_vmem [thread:$0]  (!%p5983_p12), %s5919_s11, 16, %s405_s12, [#allocation17]  }
  0xda   : > { %s3808_s21 = sshll.u32 %s4945_s24, 10  ;;  %s440_s23 = scalar_lea.vmem [#allocation12], %s3686_s25 }
  0xdb   : > { %s5310_s19 = scalar_lea.hbm %s5914_s6, %s3808_s21  ;;  %s447_s29 = sshll.u32 %s440_s23, 4  ;;  %s5312_s29 = int_to_ptr.vmem [resolvable:$true] %s447_s29 }
  0xdc   : > { %s4805_s13 = scalar_lea.hbm %s5310_s19, 1024  ;;  %p5984_p13 = scmp.ne.s32.totalorder %s5976_s10, 0 }
  0xdd   : > { %p4806_p9 = scmp.ne.s32.totalorder %s5310_s19, %s4805_s13  ;;  %s4810_s16 = scalar_lea.hbm %s5914_s6, 2048 }
  0xde   : > { %p4811_p12 = scmp.lt.u32.totalorder %s5310_s19, %s5914_s6  ;;  %p4812_p11 = scmp.lt.u32.totalorder %s4810_s16, %s4805_s13 }
  0xdf   : > { %p4808_p2 = pnand %p4806_p9, %p5984_p13  ;;  %p4814_p5 = scmp.lt.u32.totalorder %s4805_s13, %s5310_s19 }
  0xe0   : > { %p4813_p0 = por %p4812_p11, %p4811_p12 }
  0xe1   : > { %p4809_p10 = pneg %p4808_p2 }
  0xe2   : > { %p4815_p3 = por %p4814_p5, %p4813_p0 }
  0xe4   : > { %p4816_p4 = pnand %p4815_p3, %p4809_p10 }
  0xe6   : > { %4819 = shalt.err (!%p4816_p4)
}
  0xe7   : > { %s4820_s25 = scalar_lea.vmem %s5312_s29, 1024  ;;  %s4960_s27 = smov [#allocation12]  }
  0xe8   : > { %p4821_p6 = scmp.ne.s32.totalorder %s5312_s29, %s4820_s25  ;;  %s4825_s1 = sshll.u32 %s4960_s27, 4  ;;  %s4826_s1 = int_to_ptr.vmem [resolvable:$false] %s4825_s1 }
  0xe9   : > { %s4827_s5 = scalar_lea.vmem %s4826_s1, 2048  ;;  %p4828_p7 = scmp.lt.s32.totalorder %s5312_s29, %s4826_s1 }
  0xea   : > { %p4823_p8 = pnand %p4821_p6, %p5984_p13  ;;  %p4829_p9 = scmp.lt.s32.totalorder %s4827_s5, %s4820_s25 }
  0xec   : > { %p4824_p1 = pneg %p4823_p8  ;;  %p4830_p2 = por %p4829_p9, %p4828_p7 }
  0xee   : > { %p4831_p12 = pnand %p4830_p2, %p4824_p1 }
  0xf0   : > { %4834 = shalt.err (!%p4831_p12)
}
  0xf1   : > { %p5985_p10 = scmp.ne.s32.totalorder %s5974_s20, 0  ;;  %s5986_s28 = smov 4  }
  0xf2   : > { %s5987_s0 = smov 64   ;;  %s4835_s7 = scalar_lea.hbm %s5213_s14, 2048 }
  0xf3   : > { %4332 = dma.hbm_to_vmem [thread:$0]  (!%p5985_p10), %s5310_s19, 1024, %s5312_s29, %s5169_s15, %s5987_s0, %s5987_s0, %s5986_s28  }
  0xf4   : > { %p4836_p11 = scmp.ne.s32.totalorder %s5213_s14, %s4835_s7  ;;  %s4840_s18 = scalar_lea.hbm %s5916_s8, 4096 }
  0xf5   : > { %p4841_p3 = scmp.lt.u32.totalorder %s5213_s14, %s5916_s8  ;;  %p4842_p4 = scmp.lt.u32.totalorder %s4840_s18, %s4835_s7 }
  0xf6   : > { %p4838_p0 = pnand %p4836_p11, %p5984_p13  ;;  %p4844_p8 = scmp.lt.u32.totalorder %s4835_s7, %s5213_s14 }
  0xf7   : > { %p4843_p6 = por %p4842_p4, %p4841_p3 }
  0xf8   : > { %p4839_p5 = pneg %p4838_p0 }
  0xf9   : > { %p4845_p1 = por %p4844_p8, %p4843_p6 }
  0xfb   : > { %p4846_p7 = pnand %p4845_p1, %p4839_p5 }
  0xfd   : > { %4849 = shalt.err (!%p4846_p7)
}
  0xfe   : > { %s4850_s15 = scalar_lea.vmem %s5246_s30, 2048  ;;  %s4961_s19 = smov [#allocation15]  }
  0xff   : > { %p4851_p9 = scmp.ne.s32.totalorder %s5246_s30, %s4850_s15  ;;  %s4855_s29 = sshll.u32 %s4961_s19, 4  ;;  %s4856_s29 = int_to_ptr.vmem [resolvable:$false] %s4855_s29 }
 0x100   : > { %s4857_s12 = scalar_lea.vmem %s4856_s29, 4096  ;;  %p4858_p11 = scmp.lt.s32.totalorder %s5246_s30, %s4856_s29 }
 0x101   : > { %p4853_p2 = pnand %p4851_p9, %p5984_p13  ;;  %p4859_p0 = scmp.lt.s32.totalorder %s4857_s12, %s4850_s15 }
 0x103   : > { %p4854_p12 = pneg %p4853_p2  ;;  %p4860_p3 = por %p4859_p0, %p4858_p11 }
 0x105   : > { %p4861_p4 = pnand %p4860_p3, %p4854_p12 }
 0x107   : > { %4864 = shalt.err (!%p4861_p4)
}
 0x108   : > { %4338 = dma.hbm_to_vmem [thread:$0]  (!%p5985_p10), %s5213_s14, 2048, %s5246_s30, %s5217_s3, %s5987_s0, %s5987_s0, %s5986_s28  }
 0x109   : > { %p5988_p13 = scmp.ne.s32.totalorder %s5964_s26, 0 }
 0x10a   : > { %s5989_s10 = sld [smem:[#allocation28_spill]] (!%p5988_p13) }
 0x10b   : > { %509 = sbr.rel (%p5988_p13) target bundleno = 3613 (0xe1d), region = 68 }
 0x110   : > { %p5990_p5 = scmp.eq.s32.totalorder (!%p5988_p13), %s5989_s10, 0 }
 0x112   : > { %4908 = dma.done.wait (%p5990_p5), [#allocation5], 2048   ;;  %p5991_p6 = pmov %p5990_p5 }
 0x113   : > { %p5992_p8 = pmov %p5990_p5 }
 0x114   : > { %4910 = vsyncadd (%p5991_p6), [#allocation5], 4294965248 }
 0x115   : > { %4912 = dma.done.wait (%p5992_p8), [#allocation8], 288   ;;  %p5993_p1 = pmov %p5990_p5 }
 0x116   : > { %s5994_s20 = sld [smem:[#allocation26_spill]]  ;;  %s5995_s24 = sld [smem:[#allocation31_spill]] }
 0x117   : > { %4914 = vsyncadd (%p5993_p1), [#allocation8], 4294967008  ;;  %s523_s16 = sand.u32 1, %s5989_s10  }
 0x118   : > { %s524_s26 = scalar_lea.sflag [#allocation11], %s523_s16 }
 0x11c   : > { %s525_s14 = sand.u32 1, %s5994_s20   ;;  %p5996_p10 = scmp.ne.s32.totalorder %s5995_s24, 0 }
 0x11d   : > { %s4276_s3 = smul.u32 192, %s525_s14 }
 0x11f   : > { %s5376_s30 = scalar_lea.vmem [#allocation10], %s4276_s3 }
 0x120   : > { %4916 = dma.done.wait (%p5996_p10), %s524_s26, 4096  }
 0x121   : > { %4918 = vsyncadd (%p5996_p10), %s524_s26, 4294963200  ;;  %s3699_s17 = sshll.u32 %s525_s14, 6  ;;  %s3700_s9 = sshll.u32 %s525_s14, 7 }
 0x122   : > { %s5382_s25 = scalar_lea.vmem [#allocation12], %s3699_s17  ;;  %s542_s27 = scalar_lea.sflag [#allocation14], %s523_s16 }
 0x123   : > { %s5384_s1 = scalar_lea.vmem [#allocation13], %s3700_s9 }
 0x124   : > { %4920 = dma.done.wait (%p5996_p10), %s542_s27, 4096  }
 0x125   : > { %4922 = vsyncadd (%p5996_p10), %s542_s27, 4294963200  ;;  %s5390_s5 = scalar_lea.vmem [#allocation15], %s3700_s9  ;;  %p5997_p7 = pmov %p5993_p1 }
 0x126   : > { %p5998_p9 = pmov %p5993_p1 }
 0x127   : > { %4924 = dma.done.wait (%p5997_p7), [#allocation17], 1040  }
 0x128   : > { %4926 = vsyncadd (%p5998_p9), [#allocation17], 4294966256  ;;  %p618_p2 = scmp.lt.s32.totalorder %s5989_s10, 1  ;;  %s5999_s22 = sld [smem:[#allocation37_spill]] }
 0x129   : > { %p6000_p12 = scmp.ne.s32.totalorder %s5989_s10, 0 }
 0x12a   : > { %s619_s28 = scalar_select %p618_p2, %s5989_s10, 1 }
 0x12b   : > { %627 = sbr.rel (%p6000_p12) target bundleno = 971 (0x3cb), region = 108  ;;  %s6001_s15 = sld [smem:[#allocation32_spill]] (!%p6000_p12)  ;;  %v4962_v2 = vmov (!%p6000_p12), 0   ;;  %v654_v3 = vld [vmem:[#allocation4] sm:$0xff] (!%p6000_p12)  ;;  %v655_v4 = vld [vmem:[#allocation4 + $0x8] sm:$0xff] (!%p6000_p12)  ;;  %v656_v7 = vld [vmem:[#allocation4 + $0x10] sm:$0xff] (!%p6000_p12)  ;;  %v628_v29 = vlaneseq (!%p6000_p12) }
 0x12c   : > { %s4277_s0 = smul.u32 24, %s619_s28  ;;  %4404 = vset.pattern.permute.xlu1 (!%p6000_p12), %v4962_v2  ;;  %4403 = vset.pattern.permute.xlu0 (!%p6000_p12), %v4962_v2  ;;  %v4162_v6 = vpack.c.bf16 (!%p6000_p12), %v655_v4, %v654_v3  ;;  %v657_v8 = vld [vmem:[#allocation4 + $0x18] sm:$0xff] (!%p6000_p12)  ;;  %v658_v11 = vld [vmem:[#allocation4 + $0x20] sm:$0xff] (!%p6000_p12)  ;;  %v659_v12 = vld [vmem:[#allocation4 + $0x28] sm:$0xff] (!%p6000_p12)  ;;  %v4963_v33 = vmov (!%p6000_p12), 1.0   ;;  %s6002_s3 = sld [smem:[#allocation33_spill]] (!%p6000_p12) }
 0x12d   : > { %v4166_v10 = vpack.c.bf16 (!%p6000_p12), %v657_v8, %v656_v7  ;;  %v4170_v13 = vpack.c.bf16 (!%p6000_p12), %v659_v12, %v658_v11  ;;  %v660_v14 = vld [vmem:[#allocation4 + $0x30] sm:$0xff] (!%p6000_p12)  ;;  %v661_v15 = vld [vmem:[#allocation4 + $0x38] sm:$0xff] (!%p6000_p12)  ;;  %v662_v17 = vld [vmem:[#allocation4 + $0x40] sm:$0xff] (!%p6000_p12)  ;;  %v629_v30 = vand.u32 (!%p6000_p12), 127, %v628_v29  ;;  %vm832_vm4 = vcmask (!%p6000_p12), 123904  }
 0x12e   : > { %s5401_s18 = scalar_lea.vmem %s5999_s22, %s4277_s0  ;;  %4163 = vmatprep.subr.bf16.mxu0 (!%p6000_p12), %v4162_v6  ;;  %4258 = vmatprep.subr.bf16.mxu1 (!%p6000_p12), %v4162_v6  ;;  %v4174_v16 = vpack.c.bf16 (!%p6000_p12), %v661_v15, %v660_v14  ;;  %v663_v18 = vld [vmem:[#allocation4 + $0x48] sm:$0xff] (!%p6000_p12)  ;;  %v664_v20 = vld [vmem:[#allocation4 + $0x50] sm:$0xff] (!%p6000_p12)  ;;  %v665_v21 = vld [vmem:[#allocation4 + $0x58] sm:$0xff] (!%p6000_p12) }
 0x12f   : > { %4165 = vmatpush3.bf16.msra.mxu0 (!%p6000_p12), %v4162_v6  ;;  %4266 = vmatpush3.bf16.msra.mxu1 (!%p6000_p12), %v4162_v6  ;;  %v4178_v19 = vpack.c.bf16 (!%p6000_p12), %v663_v18, %v662_v17  ;;  %v4182_v22 = vpack.c.bf16 (!%p6000_p12), %v665_v21, %v664_v20  ;;  %v666_v23 = vld [vmem:[#allocation4 + $0x60] sm:$0xff] (!%p6000_p12)  ;;  %v667_v24 = vld [vmem:[#allocation4 + $0x68] sm:$0xff] (!%p6000_p12)  ;;  %v668_v26 = vld [vmem:[#allocation4 + $0x70] sm:$0xff] (!%p6000_p12) }
 0x130   : > { %4167 = vmatprep.subr.bf16.mxu0 (!%p6000_p12), %v4166_v10  ;;  %4259 = vmatprep.subr.bf16.mxu1 (!%p6000_p12), %v4166_v10  ;;  %v4186_v25 = vpack.c.bf16 (!%p6000_p12), %v667_v24, %v666_v23  ;;  %v669_v27 = vld [vmem:[#allocation4 + $0x78] sm:$0xff] (!%p6000_p12)  ;;  %v756_v36 = vld [vmem:[#allocation7 + $0x8] sm:$0xff] (!%p6000_p12)  ;;  %v755_v37 = vld [vmem:[#allocation7] sm:$0xff] (!%p6000_p12) }
 0x131   : > { %v631_v0 = vld [vmem:[%s6001_s15 + $0x8] sm:$0xff] (!%p6000_p12)  ;;  %v630_v1 = vld [vmem:[%s6001_s15] sm:$0xff] (!%p6000_p12)  ;;  %v633_v5 = vld [vmem:[%s6001_s15 + $0x18] sm:$0xff] (!%p6000_p12)  ;;  %v4190_v28 = vpack.c.bf16 (!%p6000_p12), %v669_v27, %v668_v26 }
 0x132   : > { %638 = vperm.xlu1 %4404, %v631_v0   ;;  %635 = vperm.xlu0 %4403, %v630_v1   ;;  %v632_v9 = vld [vmem:[%s6001_s15 + $0x10] sm:$0xff]  ;;  %v828_v62 = vld [vmem:[%s6002_s3] sm:$0x3] }
 0x133   : > { %4169 = vmatpush3.bf16.msra.mxu0 %v4166_v10  ;;  %4267 = vmatpush3.bf16.msra.mxu1 %v4166_v10  ;;  %v829_v63 = vcvt.s32.f32 %v828_v62  ;;  %v3710_v15 = vld [vmem:[#allocation9] ss:$0 sm:$0xff]  ;;  %v3711_v18 = vld [vmem:[#allocation9 + $0x1] ss:$0 sm:$0xff] }
 0x134   : > { %4171 = vmatprep.subr.bf16.mxu0 %v4170_v13  ;;  %4260 = vmatprep.subr.bf16.mxu1 %v4170_v13 }
 0x135   : > { %v3712_v0 = vadd.f32 -1.0, %v829_v63 }
 0x136   : > { %644 = vperm.xlu1 %4404, %v633_v5   ;;  %641 = vperm.xlu0 %4403, %v632_v9  }
 0x137   : > { %4173 = vmatpush3.bf16.msra.mxu0 %v4170_v13  ;;  %4268 = vmatpush3.bf16.msra.mxu1 %v4170_v13  ;;  %v831_v1 = vmul.f32 10000.0, %v3712_v0 }
 0x138   : > { %4175 = vmatprep.subr.bf16.mxu0 %v4174_v16  ;;  %4261 = vmatprep.subr.bf16.mxu1 %v4174_v16 }
 0x139   : > { %833 = vst.msk [vmem:[#allocation3] sm:$0x3] %vm832_vm4, %v831_v1 }
 0x13b   : > { %4177 = vmatpush3.bf16.msra.mxu0 %v4174_v16  ;;  %4269 = vmatpush3.bf16.msra.mxu1 %v4174_v16 }
 0x13c   : > { %4179 = vmatprep.subr.bf16.mxu0 %v4178_v19  ;;  %4262 = vmatprep.subr.bf16.mxu1 %v4178_v19 }
 0x13f   : > { %4181 = vmatpush3.bf16.msra.mxu0 %v4178_v19  ;;  %4270 = vmatpush3.bf16.msra.mxu1 %v4178_v19 }
 0x140   : > { %4183 = vmatprep.subr.bf16.mxu0 %v4182_v22  ;;  %4263 = vmatprep.subr.bf16.mxu1 %v4182_v22 }
 0x143   : > { %4185 = vmatpush3.bf16.msra.mxu0 %v4182_v22  ;;  %4271 = vmatpush3.bf16.msra.mxu1 %v4182_v22 }
 0x144   : > { %4187 = vmatprep.subr.bf16.mxu0 %v4186_v25  ;;  %4264 = vmatprep.subr.bf16.mxu1 %v4186_v25 }
 0x147   : > { %4189 = vmatpush3.bf16.msra.mxu0 %v4186_v25  ;;  %4272 = vmatpush3.bf16.msra.mxu1 %v4186_v25 }
 0x148   : > { %4191 = vmatprep.subr.bf16.mxu0 %v4190_v28  ;;  %4265 = vmatprep.subr.bf16.mxu1 %v4190_v28 }
 0x14b   : > { %4193 = vmatpush3.bf16.msra.mxu0 %v4190_v28  ;;  %4273 = vmatpush3.bf16.msra.mxu1 %v4190_v28 }
 0x1b1   : > { %v639_v31 = vpop.permute.xlu1 %638  ;;  %v636_v32 = vpop.permute.xlu0 %635 }
 0x1b2   : > { %vm647_vm0 = vcmp.eq.s32.totalorder %v629_v30, %v639_v31  ;;  %vm646_vm1 = vcmp.eq.s32.totalorder %v629_v30, %v636_v32 }
 0x1b3   : > { %3984 = vmatprep.mubr.msk.f32.mxu0 %vm646_vm1, %v4963_v33 }
 0x1b4   : > { %3985 = vmatmul.mubr.msk.f32.vlgmr.msra.gmra.mrb[0].mxu0 %vm647_vm0, %v4963_v33 }
 0x1b5   : > { %v645_v34 = vpop.permute.xlu1 %644  ;;  %v642_v35 = vpop.permute.xlu0 %641 }
 0x1b6   : > { %vm649_vm2 = vcmp.eq.s32.totalorder %v629_v30, %v645_v34  ;;  %vm648_vm3 = vcmp.eq.s32.totalorder %v629_v30, %v642_v35 }
 0x1b7   : > { %3987 = vmatprep.mubr.msk.f32.mxu1 %vm648_vm3, %v4963_v33 }
 0x1b8   : > { %3988 = vmatmul.mubr.msk.f32.vlgmr.msra.gmra.mrb[0].mxu1 %vm649_vm2, %v4963_v33 }
 0x287   : > { %v3986_v38 = vpop.f32.mrb[0].mxu0 }
 0x288   : > { %v758_v39 = vadd.f32 %v3986_v38, %v756_v36  ;;  %v736_v40 = vpop.f32.mrb[1].mxu0 }
 0x289   : > { %v757_v41 = vadd.f32 %v755_v37, %v736_v40 }
 0x28a   : > { %765 = vadd.xlane.f32.xlu1 %v758_v39 }
 0x28b   : > { %v3989_v42 = vpop.f32.mrb[0].mxu1  ;;  %763 = vadd.xlane.f32.xlu0 %v757_v41 }
 0x28c   : > { %v746_v43 = vpop.f32.mrb[1].mxu1  ;;  %v760_v45 = vadd.f32 %v3989_v42, %v756_v36 }
 0x28d   : > { %v759_v44 = vadd.f32 %v755_v37, %v746_v43 }
 0x28f   : > { %767 = vadd.xlane.f32.xlu0 %v759_v44 }
 0x293   : > { %769 = vadd.xlane.f32.xlu0 %v760_v45 }
 0x317   : > { %v766_v46 = vpop.xlane.xlu1 %765 }
 0x318   : > { %v773_v47 = vmul.f32 0.0078125, %v766_v46  ;;  %v764_v48 = vpop.xlane.xlu0 %763 }
 0x319   : > { %v772_v49 = vmul.f32 0.0078125, %v764_v48 }
 0x31a   : > { %v777_v50 = vsub.f32 %v758_v39, %v773_v47 }
 0x31b   : > { %v776_v51 = vsub.f32 %v757_v41, %v772_v49 }
 0x31c   : > { %v768_v52 = vpop.xlane.xlu0 %767  ;;  %v781_v53 = vmul.f32 %v777_v50, %v777_v50 }
 0x31d   : > { %v774_v54 = vmul.f32 0.0078125, %v768_v52  ;;  %v780_v55 = vmul.f32 %v776_v51, %v776_v51 }
 0x31e   : > { %786 = vadd.xlane.f32.xlu0 %v781_v53 }
 0x31f   : > { %v778_v56 = vsub.f32 %v759_v44, %v774_v54  ;;  %784 = vadd.xlane.f32.xlu1 %v780_v55 }
 0x320   : > { %v770_v57 = vpop.xlane.xlu0 %769 }
 0x321   : > { %v775_v58 = vmul.f32 0.0078125, %v770_v57  ;;  %v782_v59 = vmul.f32 %v778_v56, %v778_v56 }
 0x323   : > { %v779_v60 = vsub.f32 %v760_v45, %v775_v58  ;;  %788 = vadd.xlane.f32.xlu1 %v782_v59 }
 0x325   : > { %v783_v61 = vmul.f32 %v779_v60, %v779_v60 }
 0x327   : > { %790 = vadd.xlane.f32.xlu0 %v783_v61 }
 0x3ab   : > { %v787_v2 = vpop.xlane.xlu0 %786 }
 0x3ac   : > { %v793_v3 = vmul.f32 0.0078125, %v787_v2  ;;  %v785_v4 = vpop.xlane.xlu1 %784 }
 0x3ad   : > { %v792_v5 = vmul.f32 0.0078125, %v785_v4 }
 0x3ae   : > { %v797_v6 = vadd.f32 1e-12, %v793_v3 }
 0x3af   : > { %v796_v7 = vadd.f32 1e-12, %v792_v5 }
 0x3b0   : > { %4405 = vrsqrt.f32 %v797_v6  ;;  %v789_v8 = vpop.xlane.xlu1 %788 }
 0x3b1   : > { %4407 = vrsqrt.f32 %v796_v7  ;;  %v794_v9 = vmul.f32 0.0078125, %v789_v8 }
 0x3b3   : > { %v798_v10 = vadd.f32 1e-12, %v794_v9 }
 0x3b4   : > { %v791_v11 = vpop.xlane.xlu0 %790 }
 0x3b5   : > { %4409 = vrsqrt.f32 %v798_v10  ;;  %v795_v12 = vmul.f32 0.0078125, %v791_v11 }
 0x3b7   : > { %v799_v13 = vadd.f32 1e-12, %v795_v12 }
 0x3b9   : > { %4411 = vrsqrt.f32 %v799_v13 }
 0x3ba   : > { %v4406_v14 = vpop.eup %4405 }
 0x3bb   : > { %v4408_v16 = vpop.eup %4407  ;;  %v805_v17 = vmul.f32 %v4406_v14, %v777_v50 }
 0x3bc   : > { %v804_v19 = vmul.f32 %v4408_v16, %v776_v51 }
 0x3bd   : > { %v813_v20 = vmul.f32 %v3710_v15, %v805_v17 }
 0x3be   : > { %v812_v21 = vmul.f32 %v3710_v15, %v804_v19 }
 0x3bf   : > { %v4410_v22 = vpop.eup %4409  ;;  %v821_v23 = vadd.f32 %v3711_v18, %v813_v20 }
 0x3c0   : > { %v820_v24 = vadd.f32 %v3711_v18, %v812_v21  ;;  %v806_v25 = vmul.f32 %v4410_v22, %v778_v56 }
 0x3c1   : > { %825 = vst [vmem:[#allocation2 + $0x8] sm:$0xff] %v821_v23 }
 0x3c2   : > { %824 = vst [vmem:[#allocation2] sm:$0xff] %v820_v24  ;;  %v814_v26 = vmul.f32 %v3710_v15, %v806_v25 }
 0x3c3   : > { %v4412_v27 = vpop.eup %4411 }
 0x3c4   : > { %v822_v28 = vadd.f32 %v3711_v18, %v814_v26  ;;  %v807_v29 = vmul.f32 %v4412_v27, %v779_v60 }
 0x3c6   : > { %826 = vst [vmem:[#allocation2 + $0x10] sm:$0xff] %v822_v28  ;;  %v815_v30 = vmul.f32 %v3710_v15, %v807_v29 }
 0x3c8   : > { %v823_v31 = vadd.f32 %v3711_v18, %v815_v30 }
 0x3ca   : > { %827 = vst [vmem:[#allocation2 + $0x18] sm:$0xff] %v823_v31 }
 0x3cb PF: > { %v4413_v32 = vld [vmem:[%s5376_s30 + $0x4] ss:$12 sps:$4 sm:$0xff]   ;;  %v4415_v33 = vld [vmem:[%s5376_s30] ss:$12 sps:$4 sm:$0xff]   ;;  %v4964_v34 = vmov 0   ;;  %v835_v43 = vld [vmem:[#allocation2 + $0x8] sm:$0xff]  ;;  %v875_v63 = vlaneseq }
 0x3cc   : > { %1047 = vmatprep.mubr.bf16.mxu0 %v4964_v34  ;;  %1015 = vmatprep.subr.bf16.mxu0 %v4413_v32  ;;  %v4416_v35 = vld [vmem:[%s5376_s30 + $0x1c] ss:$12 sps:$4 sm:$0xff]   ;;  %v4418_v36 = vld [vmem:[%s5376_s30 + $0x18] ss:$12 sps:$4 sm:$0xff]   ;;  %v4419_v37 = vld [vmem:[%s5376_s30 + $0x34] ss:$12 sps:$4 sm:$0xff]  }
 0x3cd   : > { %1016 = vmatpush1.bf16.msra.mxu0 %v4415_v33  ;;  %v4421_v38 = vld [vmem:[%s5376_s30 + $0x30] ss:$12 sps:$4 sm:$0xff]   ;;  %v4422_v39 = vld [vmem:[%s5376_s30 + $0x4c] ss:$12 sps:$4 sm:$0xff]   ;;  %v4424_v41 = vld [vmem:[%s5376_s30 + $0x48] ss:$12 sps:$4 sm:$0xff]  }
 0x3ce   : > { %1017 = vmatprep.subr.bf16.mxu0 %v4416_v35  ;;  %v834_v40 = vld [vmem:[#allocation2] sm:$0xff]  ;;  %v4437_v45 = vld [vmem:[%s5376_s30 + $0x8] ss:$12 sps:$4 sm:$0xff]   ;;  %v4439_v49 = vld [vmem:[%s5376_s30 + $0x38] ss:$12 sps:$4 sm:$0xff]   ;;  %v5446_v0 = vshrl.u32 %v875_v63, 7 }
 0x3cf   : > { %v4425_v42 = vld [vmem:[%s5376_s30 + $0x64] ss:$12 sps:$4 sm:$0xff]   ;;  %v841_v44 = vpack.c.bf16 %v835_v43, %v834_v40  ;;  %v4438_v46 = vld [vmem:[%s5376_s30 + $0x20] ss:$12 sps:$4 sm:$0xff]   ;;  %3990 = vmatprep.subr.bf16.mxu1 %v4437_v45  ;;  %v4428_v48 = vld [vmem:[%s5376_s30 + $0x7c] ss:$12 sps:$4 sm:$0xff]  }
 0x3d0   : > { %v4427_v47 = vld [vmem:[%s5376_s30 + $0x60] ss:$12 sps:$4 sm:$0xff]   ;;  %3991 = vmatpush3.bf16.msra.mxu1 %v4437_v45  ;;  %v4430_v50 = vld [vmem:[%s5376_s30 + $0x78] ss:$12 sps:$4 sm:$0xff]   ;;  %v4440_v52 = vld [vmem:[%s5376_s30 + $0x50] ss:$12 sps:$4 sm:$0xff]  }
 0x3d1   : > { %1018 = vmatpush1.bf16.msra.mxu0 %v4418_v36  ;;  %4006 = vmatprep.mubr.bf16.mxu1 %v841_v44  ;;  %v4431_v51 = vld [vmem:[%s5376_s30 + $0x94] ss:$12 sps:$4 sm:$0xff]   ;;  %v4433_v53 = vld [vmem:[%s5376_s30 + $0x90] ss:$12 sps:$4 sm:$0xff]   ;;  %v4434_v54 = vld [vmem:[%s5376_s30 + $0xac] ss:$12 sps:$4 sm:$0xff]  }
 0x3d2   : > { %1019 = vmatprep.subr.bf16.mxu0 %v4419_v37  ;;  %3992 = vmatprep.subr.bf16.mxu1 %v4438_v46  ;;  %v4441_v55 = vld [vmem:[%s5376_s30 + $0x68] ss:$12 sps:$4 sm:$0xff]   ;;  %v4442_v57 = vld [vmem:[%s5376_s30 + $0x80] ss:$12 sps:$4 sm:$0xff]   ;;  %v4443_v58 = vld [vmem:[%s5376_s30 + $0x98] ss:$12 sps:$4 sm:$0xff]  }
 0x3d3   : > { %v4436_v56 = vld [vmem:[%s5376_s30 + $0xa8] ss:$12 sps:$4 sm:$0xff]   ;;  %v836_v59 = vld [vmem:[#allocation2 + $0x10] sm:$0xff]  ;;  %v1123_v1 = vadd.s32 1, %v5446_v0  ;;  %v1118_v2 = vand.u32 127, %v875_v63  ;;  %v1121_v3 = vmul.u32 32, %v5446_v0 }
 0x3d4   : > { %3993 = vmatpush3.bf16.msra.mxu1 %v4438_v46  ;;  %v837_v60 = vld [vmem:[#allocation2 + $0x18] sm:$0xff]  ;;  %v4444_v61 = vld [vmem:[%s5376_s30 + $0xb0] ss:$12 sps:$4 sm:$0xff]   ;;  %v4965_v5 = vmov 1966171168   ;;  %v4966_v9 = vmov 0.0  }
 0x3d5   : > { %1020 = vmatpush1.bf16.msra.mxu0 %v4421_v38  ;;  %3994 = vmatprep.subr.bf16.mxu1 %v4439_v49  ;;  %v842_v62 = vpack.c.bf16 %v837_v60, %v836_v59  ;;  %v1124_v4 = vmul.u32 32, %v1123_v1  ;;  %v1130_v6 = vunpack.c.l.s4 %v4965_v5  ;;  %vm1122_vm5 = vcmp.ge.s32.totalorder %v1118_v2, %v1121_v3  ;;  %v5460_v16 = vld [vmem:[%s5401_s18] sm:$0xff]  ;;  %v839_v17 = vld [vmem:[%s5401_s18 + $0x8] sm:$0xff]  ;;  %s6003_s26 = sld [smem:[#allocation28_spill]] }
 0x3d6   : > { %1021 = vmatprep.subr.bf16.mxu0 %v4422_v39  ;;  %v5455_v13 = vsub.s32 0, %v5446_v0  ;;  %vm1855_vm8 = vcmask 130048  }
 0x3d7   : > { %vm1125_vm6 = vcmp.lt.s32.totalorder %v1118_v2, %v1124_v4  ;;  %v1131_v7 = vunpack.c.0.s8 %v1130_v6 }
 0x3d8   : > { %3995 = vmatpush3.bf16.msra.mxu1 %v4439_v49  ;;  %vm1126_vm7 = vmand %vm1122_vm5, %vm1125_vm6  ;;  %v5465_v18 = vrot.slane %v5460_v16, %v5455_v13  ;;  %v882_v21 = vrot.slane %v839_v17, %v5455_v13 }
 0x3d9   : > { %1022 = vmatpush1.bf16.msra.mxu0 %v4424_v41  ;;  %3996 = vmatprep.subr.bf16.mxu1 %v4440_v52  ;;  %v5451_v8 = vsub.s32 %v1131_v7, %v5446_v0  ;;  %v1127_v10 = vsel %vm1126_vm7, 1.0, %v4966_v9 }
 0x3da   : > { %1023 = vmatprep.subr.bf16.mxu0 %v4425_v42 }
 0x3db   : > { %v1135_v11 = vrot.slane %v1127_v10, %v5451_v8  ;;  %p3794_p11 = scmp.ne.s32.totalorder %s6003_s26, 1 }
 0x3dc   : > { %3997 = vmatpush3.bf16.msra.mxu1 %v4440_v52  ;;  %vm4968_vm9 = vmmov (!%p3794_p11), 0  }
 0x3dd   : > { %1024 = vmatpush1.bf16.msra.mxu0 %v4427_v47  ;;  %3998 = vmatprep.subr.bf16.mxu1 %v4441_v55  ;;  %v1136_v12 = vcombine.high %v1135_v11, %v1135_v11  ;;  %v1143_v14 = vrot.slane %v1135_v11, %v5451_v8  ;;  %v840_v47 = vld [vmem:[%s5401_s18 + $0x10] sm:$0xff] }
 0x3de   : > { %1025 = vmatprep.subr.bf16.mxu0 %v4428_v48 }
 0x3df   : > { %v1150_v15 = vrot.slane %v1136_v12, %v5451_v8  ;;  %v1151_v19 = vcombine.high %v1143_v14, %v1143_v14  ;;  %v5469_v23 = vrot.slane %v1143_v14, %v5455_v13 }
 0x3e0   : > { %3999 = vmatpush3.bf16.msra.mxu1 %v4441_v55 }
 0x3e1   : > { %1026 = vmatpush1.bf16.msra.mxu0 %v4430_v50  ;;  %4000 = vmatprep.subr.bf16.mxu1 %v4442_v57  ;;  %v1152_v20 = vcombine.high %v1150_v15, %v1150_v15  ;;  %v5475_v26 = vrot.slane %v1151_v19, %v5455_v13  ;;  %v5478_v27 = vrot.slane %v1150_v15, %v5455_v13 }
 0x3e2   : > { %1027 = vmatprep.subr.bf16.mxu0 %v4431_v51 }
 0x3e3   : > { %v5481_v28 = vrot.slane %v1152_v20, %v5455_v13 }
 0x3e4   : > { %4001 = vmatpush3.bf16.msra.mxu1 %v4442_v57 }
 0x3e5   : > { %1028 = vmatpush1.bf16.msra.mxu0 %v4433_v53  ;;  %4002 = vmatprep.subr.bf16.mxu1 %v4443_v58  ;;  %v886_v53 = vrot.slane %v840_v47, %v5455_v13 }
 0x3e6   : > { %1029 = vmatprep.subr.bf16.mxu0 %v4434_v54 }
 0x3e8   : > { %4003 = vmatpush3.bf16.msra.mxu1 %v4443_v58 }
 0x3e9   : > { %1030 = vmatpush1.bf16.msra.mxu0 %v4436_v56  ;;  %4004 = vmatprep.subr.bf16.mxu1 %v4444_v61 }
 0x3ec   : > { %1048 = vmatmul.mubr.bf16.vlgmr.msra.gmra.mrb[0].mxu0 %v841_v44  ;;  %4005 = vmatpush3.bf16.msra.mxu1 %v4444_v61 }
 0x3ed   : > { %1057 = vmatprep.mubr.bf16.mxu0 %v4964_v34 }
 0x3ef   : > { %4007 = vmatmul.mubr.bf16.vlgmr.msra.gmra.mrb[0].mxu1 %v842_v62 }
 0x3f4   : > { %1058 = vmatmul.mubr.bf16.gmra.mrb[4].mxu0 %v842_v62 }
 0x4bf   : > { %v1049_v22 = vpop.f32.mrb[0].mxu0 }
 0x4c0   : > { %v5472_v24 = vadd.f32 %v1049_v22, %v5465_v18  ;;  %v1051_v25 = vpop.f32.mrb[1].mxu0 }
 0x4c1   : > { %v1052_v29 = vadd.f32 %v1051_v25, %v882_v21  ;;  %v1053_v30 = vpop.f32.mrb[2].mxu0 }
 0x4c2   : > { %v1055_v31 = vpop.f32.mrb[3].mxu0  ;;  %4014 = vmatprep.mubr.f32.mxu1 %v5472_v24  ;;  %v4008_v56 = vpop.f32.mrb[0].mxu1  ;;  %v1054_v4 = vadd.f32 %v1053_v30, %v5465_v18 }
 0x4c3   : > { %v1056_v32 = vadd.f32 %v1055_v31, %v882_v21  ;;  %v1173_v33 = vmul.f32 %v5469_v23, %v1052_v29  ;;  %v1177_v35 = vmul.f32 %v5478_v27, %v1052_v29  ;;  %v1181_v36 = vmul.f32 %v5475_v26, %v1052_v29  ;;  %v1102_v61 = vpop.f32.mrb[1].mxu1 }
 0x4c4   : > { %v1185_v37 = vmul.f32 %v5481_v28, %v1052_v29  ;;  %v1111_v60 = vadd.f32 %v4008_v56, %v886_v53  ;;  %v4009_v3 = vpop.f32.mrb[2].mxu1  ;;  %v1103_v5 = vadd.f32 %v1102_v61, %v886_v53 }
 0x4c5   : > { %v1174_v38 = vmul.f32 %v5469_v23, %v1056_v32  ;;  %v1178_v39 = vmul.f32 %v5478_v27, %v1056_v32  ;;  %v1182_v40 = vmul.f32 %v5475_v26, %v1056_v32  ;;  %v1186_v41 = vmul.f32 %v5481_v28, %v1056_v32  ;;  %v1105_v7 = vpop.f32.mrb[3].mxu1 }
 0x4c6   : > { %v1114_v6 = vadd.f32 %v4009_v3, %v886_v53  ;;  %v1106_v15 = vadd.f32 %v1105_v7, %v886_v53 }
 0x4c7   : > { %v1059_v42 = vpop.f32.mrb[4].mxu0  ;;  %v4194_v43 = vpack.c.bf16 %v1174_v38, %v1173_v33  ;;  %v4202_v44 = vpack.c.bf16 %v1178_v39, %v1177_v35  ;;  %v4210_v45 = vpack.c.bf16 %v1182_v40, %v1181_v36  ;;  %v5492_v46 = vpack.c.bf16 %v1186_v41, %v1185_v37 }
 0x4c8   : > { %v1060_v48 = vadd.f32 %v1059_v42, %v5465_v18  ;;  %v1061_v49 = vpop.f32.mrb[5].mxu0  ;;  %v5506_v14 = vpack.c.bf16 %v1114_v6, %v1111_v60  ;;  %v5508_v17 = vpack.c.bf16 %v1106_v15, %v1103_v5 }
 0x4c9   : > { %v1062_v50 = vadd.f32 %v1061_v49, %v882_v21  ;;  %v1063_v51 = vpop.f32.mrb[6].mxu0  ;;  %4195 = vmatprep.subr.bf16.mxu1 %v4194_v43 }
 0x4ca   : > { %v1065_v52 = vpop.f32.mrb[7].mxu0  ;;  %4197 = vmatpush3.bf16.xpose.msra.mxu1 %v4194_v43  ;;  %4049 = vmatprep.mubr.f32.mxu0 %v1060_v48  ;;  %v1064_v19 = vadd.f32 %v1063_v51, %v5465_v18  ;;  %v3737_v18 = vld.sshfl [vmem:[#allocation3] sm:$0x11 pattern:$0x75316420] }
 0x4cb   : > { %v1066_v54 = vadd.f32 %v1065_v52, %v882_v21  ;;  %v1175_v55 = vmul.f32 %v5469_v23, %v1062_v50  ;;  %v1183_v57 = vmul.f32 %v5475_v26, %v1062_v50  ;;  %v1187_v58 = vmul.f32 %v5481_v28, %v1062_v50 }
 0x4cc   : > { %v1179_v59 = vmul.f32 %v5478_v27, %v1062_v50  ;;  %v1821_v20 = vrot.slane %v3737_v18, %v5451_v8  ;;  %v1814_v22 = vcombine.high %v3737_v18, %v3737_v18 }
 0x4cd   : > { %v1176_v62 = vmul.f32 %v5469_v23, %v1066_v54  ;;  %v1184_v63 = vmul.f32 %v5475_v26, %v1066_v54  ;;  %v1188_v1 = vmul.f32 %v5481_v28, %v1066_v54  ;;  %v1180_v2 = vmul.f32 %v5478_v27, %v1066_v54 }
 0x4ce   : > { %v5524_v21 = vrot.slane %v1821_v20, %v5455_v13  ;;  %v1828_v32 = vrot.slane %v1814_v22, %v5451_v8 }
 0x4cf   : > { %v4198_v9 = vpack.c.bf16 %v1176_v62, %v1175_v55  ;;  %v4214_v10 = vpack.c.bf16 %v1184_v63, %v1183_v57  ;;  %v4222_v11 = vpack.c.bf16 %v1188_v1, %v1187_v58  ;;  %v4206_v12 = vpack.c.bf16 %v1180_v2, %v1179_v59 }
 0x4d0   : > { %v5536_v36 = vrot.slane %v1828_v32, %v5455_v13 }
 0x4d1   : > { %4015 = vmatmul.mubr.f32.vlgmr.msra.gmra.mrb[4].mxu1 %v1054_v4  ;;  %4199 = vmatprep.subr.bf16.mxu1 %v4198_v9 }
 0x4d2   : > { %4215 = vmatprep.subr.bf16.mxu0 %v4214_v10  ;;  %4201 = vmatpush3.bf16.xpose.msra.mxu1 %v4198_v9 }
 0x4d3   : > { %4021 = vmatprep.mubr.f32.mxu1 %v1060_v48  ;;  %4217 = vmatpush3.bf16.xpose.msra.mxu0 %v4214_v10 }
 0x4d4   : > { %4203 = vmatprep.subr.bf16.mxu1 %v4202_v44  ;;  %4223 = vmatprep.subr.bf16.mxu0 %v4222_v11 }
 0x4d9   : > { %4022 = vmatmul.mubr.f32.vlgmr.msra.gmra.mrb[6].mxu1 %v1064_v19 }
 0x4da   : > { %4050 = vmatmul.mubr.f32.vlgmr.msra.gmra.mrb[8].mxu0 %v1064_v19  ;;  %4205 = vmatpush3.bf16.xpose.msra.mxu1 %v4202_v44 }
 0x4db   : > { %4028 = vmatprep.mubr.f32.mxu1 %v5472_v24  ;;  %4225 = vmatpush3.bf16.xpose.msra.mxu0 %v4222_v11 }
 0x4dc   : > { %4063 = vmatprep.mubr.f32.mxu0 %v1060_v48  ;;  %4207 = vmatprep.subr.bf16.mxu1 %v4206_v12 }
 0x4dd   : > { %4235 = vmatprep.subr.bf16.mxu0 %v5508_v17 }
 0x4e1   : > { %4029 = vmatmul.mubr.f32.vlgmr.msra.gmra.mrb[8].mxu1 %v1054_v4 }
 0x4e2   : > { %4064 = vmatmul.mubr.f32.vlgmr.msra.gmra.mrb[10].mxu0 %v1064_v19  ;;  %4209 = vmatpush3.bf16.xpose.msra.mxu1 %v4206_v12 }
 0x4e3   : > { %4035 = vmatprep.mubr.f32.mxu1 %v1060_v48  ;;  %4211 = vmatprep.subr.bf16.mxu1 %v4210_v45 }
 0x4e4   : > { %4237 = vmatpush3.bf16.msra.mxu0 %v5508_v17 }
 0x4e5   : > { %4243 = vmatprep.subr.bf16.mxu0 %v5508_v17 }
 0x4e9   : > { %4036 = vmatmul.mubr.f32.vlgmr.msra.gmra.mrb[10].mxu1 %v1064_v19 }
 0x4ea   : > { %4213 = vmatpush3.bf16.xpose.msra.mxu1 %v4210_v45  ;;  %4042 = vmatprep.mubr.f32.mxu1 %v5472_v24 }
 0x4eb   : > { %4219 = vmatprep.subr.bf16.mxu1 %v5492_v46 }
 0x4f1   : > { %4043 = vmatmul.mubr.f32.vlgmr.msra.gmra.mrb[12].mxu1 %v1054_v4 }
 0x4f2   : > { %4221 = vmatpush3.bf16.xpose.msra.mxu1 %v5492_v46  ;;  %4056 = vmatprep.mubr.f32.mxu1 %v5472_v24 }
 0x4f3   : > { %4227 = vmatprep.subr.bf16.mxu1 %v5508_v17 }
 0x4f9   : > { %4057 = vmatmul.mubr.f32.vlgmr.msra.gmra.mrb[14].mxu1 %v1054_v4 }
 0x4fa   : > { %4229 = vmatpush3.bf16.msra.mxu1 %v5508_v17 }
 0x4fb   : > { %4231 = vmatprep.subr.bf16.mxu1 %v5506_v14 }
 0x5a4   : > { %v4016_v25 = vpop.f32.mrb[4].mxu1 }
 0x5a5   : > { %v1790_v29 = vmul.f32 0.17677669, %v4016_v25  ;;  %v1255_v30 = vpop.f32.mrb[5].mxu1 }
 0x5a6   : > { %v1789_v31 = vmul.f32 0.17677669, %v1255_v30 }
 0x5a7   : > { %v5527_v24 = vadd.f32 %v5524_v21, %v1790_v29 }
 0x5a8   : > { %v5533_v35 = vadd.f32 %v5524_v21, %v1789_v31 }
 0x5a9   : > { %v1859_v33 = vsel %vm1855_vm8, %v5527_v24, -inf }
 0x5aa   : > { %1860 = vmax.xlane.f32.xlu0 %v1859_v33  ;;  %v1856_v41 = vsel %vm1855_vm8, %v5533_v35, -inf }
 0x5ac   : > { %v4023_v37 = vpop.f32.mrb[6].mxu1 }
 0x5ad   : > { %v1792_v38 = vmul.f32 0.17677669, %v4023_v37  ;;  %v4051_v39 = vpop.f32.mrb[8].mxu0  ;;  %v1330_v40 = vpop.f32.mrb[7].mxu1 }
 0x5ae   : > { %v1800_v42 = vmul.f32 0.17677669, %v4051_v39  ;;  %v1630_v43 = vpop.f32.mrb[9].mxu0  ;;  %1857 = vmax.xlane.f32.xlu0 %v1856_v41  ;;  %v1791_v45 = vmul.f32 0.17677669, %v1330_v40 }
 0x5af   : > { %v1799_v8 = vmul.f32 0.17677669, %v1630_v43  ;;  %v5541_v44 = vadd.f32 %v5536_v36, %v1792_v38 }
 0x5b0   : > { %v5549_v47 = vadd.f32 %v5536_v36, %v1800_v42  ;;  %v5556_v54 = vadd.f32 %v5536_v36, %v1791_v45 }
 0x5b1   : > { %v1865_v46 = vsel %vm1855_vm8, %v5541_v44, -inf  ;;  %v5546_v13 = vadd.f32 %v5536_v36, %v1799_v8 }
 0x5b2   : > { %1866 = vmax.xlane.f32.xlu1 %v1865_v46  ;;  %v1889_v53 = vsel %vm1855_vm8, %v5549_v47, -inf  ;;  %v1862_v58 = vsel %vm1855_vm8, %v5556_v54, -inf }
 0x5b3   : > { %v1886_v48 = vsel %vm1855_vm8, %v5546_v13, -inf }
 0x5b4   : > { %1887 = vmax.xlane.f32.xlu0 %v1886_v48  ;;  %v4030_v49 = vpop.f32.mrb[8].mxu1 }
 0x5b5   : > { %v1794_v50 = vmul.f32 0.17677669, %v4030_v49  ;;  %v4065_v51 = vpop.f32.mrb[10].mxu0  ;;  %v1405_v52 = vpop.f32.mrb[9].mxu1 }
 0x5b6   : > { %v1793_v55 = vmul.f32 0.17677669, %v1405_v52  ;;  %v1780_v56 = vpop.f32.mrb[11].mxu0  ;;  %1890 = vmax.xlane.f32.xlu1 %v1889_v53  ;;  %v1804_v22 = vmul.f32 0.17677669, %v4065_v51 }
 0x5b7   : > { %v5564_v59 = vadd.f32 %v5524_v21, %v1794_v50  ;;  %v1803_v30 = vmul.f32 0.17677669, %v1780_v56 }
 0x5b8   : > { %v5559_v57 = vadd.f32 %v5524_v21, %v1793_v55  ;;  %v5599_v38 = vadd.f32 %v5536_v36, %v1804_v22 }
 0x5b9   : > { %v1871_v1 = vsel %vm1855_vm8, %v5564_v59, -inf  ;;  %v5604_v40 = vadd.f32 %v5536_v36, %v1803_v30 }
 0x5ba   : > { %1863 = vmax.xlane.f32.xlu1 %v1862_v58  ;;  %v1868_v60 = vsel %vm1855_vm8, %v5559_v57, -inf  ;;  %v1901_v41 = vsel %vm1855_vm8, %v5599_v38, -inf }
 0x5bb   : > { %1869 = vmax.xlane.f32.xlu0 %v1868_v60 }
 0x5bc   : > { %v4037_v61 = vpop.f32.mrb[10].mxu1 }
 0x5bd   : > { %v1796_v62 = vmul.f32 0.17677669, %v4037_v61  ;;  %v1480_v63 = vpop.f32.mrb[11].mxu1 }
 0x5be   : > { %v1795_v2 = vmul.f32 0.17677669, %v1480_v63  ;;  %1872 = vmax.xlane.f32.xlu1 %v1871_v1 }
 0x5bf   : > { %v5571_v3 = vadd.f32 %v5536_v36, %v1796_v62 }
 0x5c0   : > { %v5574_v4 = vadd.f32 %v5536_v36, %v1795_v2 }
 0x5c1   : > { %v1877_v5 = vsel %vm1855_vm8, %v5571_v3, -inf }
 0x5c2   : > { %1878 = vmax.xlane.f32.xlu1 %v1877_v5  ;;  %v1874_v6 = vsel %vm1855_vm8, %v5574_v4, -inf }
 0x5c3   : > { %1875 = vmax.xlane.f32.xlu0 %v1874_v6 }
 0x5c4   : > { %v4044_v7 = vpop.f32.mrb[12].mxu1 }
 0x5c5   : > { %v1798_v9 = vmul.f32 0.17677669, %v4044_v7  ;;  %v1555_v10 = vpop.f32.mrb[13].mxu1 }
 0x5c6   : > { %v1797_v11 = vmul.f32 0.17677669, %v1555_v10 }
 0x5c7   : > { %v5581_v12 = vadd.f32 %v5524_v21, %v1798_v9 }
 0x5c8   : > { %v5584_v15 = vadd.f32 %v5524_v21, %v1797_v11 }
 0x5c9   : > { %v1883_v19 = vsel %vm1855_vm8, %v5581_v12, -inf }
 0x5ca   : > { %1884 = vmax.xlane.f32.xlu1 %v1883_v19  ;;  %v1880_v18 = vsel %vm1855_vm8, %v5584_v15, -inf }
 0x5cb   : > { %1881 = vmax.xlane.f32.xlu0 %v1880_v18 }
 0x5cc   : > { %v4058_v20 = vpop.f32.mrb[14].mxu1 }
 0x5cd   : > { %v1802_v25 = vmul.f32 0.17677669, %v4058_v20  ;;  %v1705_v29 = vpop.f32.mrb[15].mxu1 }
 0x5ce   : > { %v1801_v31 = vmul.f32 0.17677669, %v1705_v29 }
 0x5cf   : > { %v5591_v32 = vadd.f32 %v5524_v21, %v1802_v25 }
 0x5d0   : > { %v5594_v33 = vadd.f32 %v5524_v21, %v1801_v31  ;;  %v1898_v21 = vsel %vm1855_vm8, %v5604_v40, -inf }
 0x5d1   : > { %v1895_v37 = vsel %vm1855_vm8, %v5591_v32, -inf }
 0x5d2   : > { %1896 = vmax.xlane.f32.xlu1 %v1895_v37  ;;  %v1892_v39 = vsel %vm1855_vm8, %v5594_v33, -inf }
 0x5d3   : > { %1893 = vmax.xlane.f32.xlu0 %v1892_v39 }
 0x5d6   : > { %1902 = vmax.xlane.f32.xlu1 %v1901_v41 }
 0x5d7   : > { %1899 = vmax.xlane.f32.xlu0 %v1898_v21 }
 0x637   : > { %v1861_v42 = vpop.xlane.xlu0 %1860 }
 0x638   : > { %v1905_v43 = vsub.f32 %v5527_v24, %v1861_v42 }
 0x63a   : > { %v1922_v8 = vmul.f32 1.442695, %v1905_v43 }
 0x63b   : > { %v1858_v45 = vpop.xlane.xlu0 %1857 }
 0x63c   : > { %4493 = vpow2.f32 %v1922_v8  ;;  %v1904_v46 = vsub.f32 %v5533_v35, %v1858_v45 }
 0x63e   : > { %v1920_v48 = vmul.f32 1.442695, %v1904_v46 }
 0x63f   : > { %v1867_v36 = vpop.xlane.xlu1 %1866 }
 0x640   : > { %4495 = vpow2.f32 %v1920_v48  ;;  %v1907_v49 = vsub.f32 %v5541_v44, %v1867_v36 }
 0x641   : > { %v1888_v51 = vpop.xlane.xlu0 %1887 }
 0x642   : > { %v1926_v50 = vmul.f32 1.442695, %v1907_v49  ;;  %v1914_v24 = vsub.f32 %v5546_v13, %v1888_v51 }
 0x643   : > { %v1891_v52 = vpop.xlane.xlu1 %1890 }
 0x644   : > { %4497 = vpow2.f32 %v1926_v50  ;;  %v1915_v53 = vsub.f32 %v5549_v47, %v1891_v52  ;;  %v1940_v62 = vmul.f32 1.442695, %v1914_v24 }
 0x646   : > { %v5614_v55 = vpop.eup %4493  ;;  %v1942_v56 = vmul.f32 1.442695, %v1915_v53 }
 0x647   : > { %v1864_v58 = vpop.xlane.xlu1 %1863  ;;  %v1955_v35 = vsel %vm1855_vm8, %v5614_v55, 0.0 }
 0x648   : > { %4499 = vpow2.f32 %v1942_v56  ;;  %v1906_v60 = vsub.f32 %v5556_v54, %v1864_v58  ;;  %v1870_v61 = vpop.xlane.xlu0 %1869  ;;  %1956 = vadd.xlane.f32.xlu1 %v1955_v35 }
 0x649   : > { %v1908_v47 = vsub.f32 %v5559_v57, %v1870_v61 }
 0x64a   : > { %v5620_v44 = vpop.eup %4495  ;;  %v1924_v63 = vmul.f32 1.442695, %v1906_v60 }
 0x64b   : > { %v1873_v1 = vpop.xlane.xlu1 %1872  ;;  %v1952_v13 = vsel %vm1855_vm8, %v5620_v44, 0.0  ;;  %v1928_v54 = vmul.f32 1.442695, %v1908_v47 }
 0x64c   : > { %4501 = vpow2.f32 %v1924_v63  ;;  %v1909_v2 = vsub.f32 %v5564_v59, %v1873_v1  ;;  %1953 = vadd.xlane.f32.xlu0 %v1952_v13 }
 0x64d   : > { %4503 = vpow2.f32 %v1940_v62 }
 0x64e   : > { %v5626_v5 = vpop.eup %4497  ;;  %v1930_v6 = vmul.f32 1.442695, %v1909_v2 }
 0x64f   : > { %v1879_v7 = vpop.xlane.xlu1 %1878  ;;  %v1961_v9 = vsel %vm1855_vm8, %v5626_v5, 0.0 }
 0x650   : > { %4505 = vpow2.f32 %v1930_v6  ;;  %v1911_v57 = vsub.f32 %v5571_v3, %v1879_v7  ;;  %v1876_v10 = vpop.xlane.xlu0 %1875  ;;  %1962 = vadd.xlane.f32.xlu1 %v1961_v9 }
 0x651   : > { %v1910_v11 = vsub.f32 %v5574_v4, %v1876_v10  ;;  %4507 = vpow2.f32 %v1928_v54 }
 0x652   : > { %v5632_v19 = vpop.eup %4499  ;;  %v1934_v59 = vmul.f32 1.442695, %v1911_v57 }
 0x653   : > { %v1932_v18 = vmul.f32 1.442695, %v1910_v11  ;;  %v1985_v20 = vsel %vm1855_vm8, %v5632_v19, 0.0 }
 0x654   : > { %4509 = vpow2.f32 %v1934_v59  ;;  %1986 = vadd.xlane.f32.xlu1 %v1985_v20 }
 0x655   : > { %4511 = vpow2.f32 %v1932_v18 }
 0x656   : > { %v5636_v22 = vpop.eup %4501 }
 0x657   : > { %v1885_v25 = vpop.xlane.xlu1 %1884  ;;  %v1958_v3 = vsel %vm1855_vm8, %v5636_v22, 0.0  ;;  %v5640_v29 = vpop.eup %4503 }
 0x658   : > { %v1913_v4 = vsub.f32 %v5581_v12, %v1885_v25  ;;  %v1882_v30 = vpop.xlane.xlu0 %1881  ;;  %1959 = vadd.xlane.f32.xlu0 %v1958_v3  ;;  %v1982_v42 = vsel %vm1855_vm8, %v5640_v29, 0.0 }
 0x659   : > { %v1912_v31 = vsub.f32 %v5584_v15, %v1882_v30 }
 0x65a   : > { %v5644_v37 = vpop.eup %4505  ;;  %v1938_v39 = vmul.f32 1.442695, %v1913_v4 }
 0x65b   : > { %v1936_v41 = vmul.f32 1.442695, %v1912_v31  ;;  %v1967_v21 = vsel %vm1855_vm8, %v5644_v37, 0.0  ;;  %v5650_v43 = vpop.eup %4507 }
 0x65c   : > { %4513 = vpow2.f32 %v1938_v39  ;;  %1968 = vadd.xlane.f32.xlu1 %v1967_v21  ;;  %1983 = vadd.xlane.f32.xlu0 %v1982_v42  ;;  %v1964_v45 = vsel %vm1855_vm8, %v5650_v43, 0.0 }
 0x65d   : > { %4515 = vpow2.f32 %v1936_v41 }
 0x65e   : > { %v5652_v12 = vpop.eup %4509 }
 0x65f   : > { %v1897_v8 = vpop.xlane.xlu1 %1896  ;;  %v1973_v15 = vsel %vm1855_vm8, %v5652_v12, 0.0  ;;  %v5658_v46 = vpop.eup %4511 }
 0x660   : > { %v1917_v48 = vsub.f32 %v5591_v32, %v1897_v8  ;;  %1974 = vadd.xlane.f32.xlu1 %v1973_v15  ;;  %1965 = vadd.xlane.f32.xlu0 %v1964_v45  ;;  %v1894_v36 = vpop.xlane.xlu0 %1893  ;;  %v1970_v53 = vsel %vm1855_vm8, %v5658_v46, 0.0 }
 0x661   : > { %v1916_v49 = vsub.f32 %v5594_v33, %v1894_v36 }
 0x662   : > { %v1946_v50 = vmul.f32 1.442695, %v1917_v48 }
 0x663   : > { %v1944_v51 = vmul.f32 1.442695, %v1916_v49  ;;  %v1903_v52 = vpop.xlane.xlu1 %1902 }
 0x664   : > { %4517 = vpow2.f32 %v1946_v50  ;;  %v1919_v24 = vsub.f32 %v5599_v38, %v1903_v52  ;;  %1971 = vadd.xlane.f32.xlu0 %v1970_v53  ;;  %v1900_v56 = vpop.xlane.xlu0 %1899 }
 0x665   : > { %4519 = vpow2.f32 %v1944_v51  ;;  %v1918_v58 = vsub.f32 %v5604_v40, %v1900_v56 }
 0x666   : > { %v5666_v32 = vpop.eup %4513  ;;  %v1950_v35 = vmul.f32 1.442695, %v1919_v24 }
 0x667   : > { %v5668_v60 = vpop.eup %4515  ;;  %v1948_v33 = vmul.f32 1.442695, %v1918_v58  ;;  %v1979_v61 = vsel %vm1855_vm8, %v5666_v32, 0.0 }
 0x668   : > { %4521 = vpow2.f32 %v1950_v35  ;;  %1980 = vadd.xlane.f32.xlu1 %v1979_v61  ;;  %v1976_v62 = vsel %vm1855_vm8, %v5668_v60, 0.0 }
 0x669   : > { %4523 = vpow2.f32 %v1948_v33  ;;  %1977 = vadd.xlane.f32.xlu0 %v1976_v62 }
 0x66e   : > { %v5674_v38 = vpop.eup %4517 }
 0x66f   : > { %v5676_v63 = vpop.eup %4519  ;;  %v1991_v40 = vsel %vm1855_vm8, %v5674_v38, 0.0 }
 0x670   : > { %1992 = vadd.xlane.f32.xlu1 %v1991_v40  ;;  %v1988_v47 = vsel %vm1855_vm8, %v5676_v63, 0.0  ;;  %v4448_v40 = vld [vmem:[%s5382_s25 + $0x18] sm:$0xff]  }
 0x671   : > { %1989 = vadd.xlane.f32.xlu0 %v1988_v47  ;;  %v4449_v47 = vld [vmem:[%s5382_s25 + $0x20] sm:$0xff]  }
 0x672   : > { %v5682_v1 = vpop.eup %4521 }
 0x673   : > { %v5684_v13 = vpop.eup %4523  ;;  %v1997_v2 = vsel %vm1855_vm8, %v5682_v1, 0.0 }
 0x674   : > { %1998 = vadd.xlane.f32.xlu1 %v1997_v2  ;;  %v1994_v54 = vsel %vm1855_vm8, %v5684_v13, 0.0  ;;  %v4452_v2 = vld [vmem:[%s5382_s25 + $0x38] sm:$0xff]  }
 0x675   : > { %1995 = vadd.xlane.f32.xlu0 %v1994_v54 }
 0x6d5   : > { %v1957_v6 = vpop.xlane.xlu1 %1956 }
 0x6d6   : > { %4525 = vrcp.f32 %v1957_v6 }
 0x6d9   : > { %v1954_v7 = vpop.xlane.xlu0 %1953 }
 0x6da   : > { %4527 = vrcp.f32 %v1954_v7 }
 0x6dd   : > { %v1963_v9 = vpop.xlane.xlu1 %1962 }
 0x6de   : > { %4529 = vrcp.f32 %v1963_v9 }
 0x6e0   : > { %v4526_v57 = vpop.eup %4525 }
 0x6e1   : > { %v1987_v11 = vpop.xlane.xlu1 %1986  ;;  %v2017_v20 = vmul.f32 %v4526_v57, %v5614_v55 }
 0x6e4   : > { %v4528_v10 = vpop.eup %4527 }
 0x6e5   : > { %v1960_v59 = vpop.xlane.xlu0 %1959  ;;  %v2016_v18 = vmul.f32 %v4528_v10, %v5620_v44 }
 0x6e6   : > { %4531 = vrcp.f32 %v1960_v59 }
 0x6e7   : > { %4070 = vmatprep.mubr.msk.f32.mxu1 %vm1855_vm8, %v2016_v18 }
 0x6e8   : > { %4071 = vmatmul.mubr.msk.f32.vlgmr.msra.gmra.mrb[16].mxu1 %vm1855_vm8, %v2017_v20  ;;  %v4530_v31 = vpop.eup %4529 }
 0x6e9   : > { %4233 = vmatpush3.bf16.msra.mxu1 %v5506_v14  ;;  %v1969_v25 = vpop.xlane.xlu1 %1968  ;;  %v1984_v3 = vpop.xlane.xlu0 %1983  ;;  %v2019_v41 = vmul.f32 %v4530_v31, %v5626_v5 }
 0x6ea   : > { %4239 = vmatprep.subr.bf16.mxu1 %v5506_v14  ;;  %4533 = vrcp.f32 %v1969_v25 }
 0x6ed   : > { %v1966_v4 = vpop.xlane.xlu0 %1965  ;;  %v1975_v30 = vpop.xlane.xlu1 %1974 }
 0x6ee   : > { %4535 = vrcp.f32 %v1966_v4 }
 0x6ef   : > { %4537 = vrcp.f32 %v1984_v3 }
 0x6f0   : > { %v4532_v39 = vpop.eup %4531  ;;  %4539 = vrcp.f32 %v1975_v30 }
 0x6f1   : > { %v1972_v55 = vpop.xlane.xlu0 %1971  ;;  %v2018_v44 = vmul.f32 %v4532_v39, %v5636_v22 }
 0x6f2   : > { %4541 = vrcp.f32 %v1972_v55 }
 0x6f3   : > { %4077 = vmatprep.mubr.msk.f32.mxu1 %vm1855_vm8, %v2018_v44  ;;  %4543 = vrcp.f32 %v1987_v11 }
 0x6f4   : > { %4078 = vmatmul.mubr.msk.f32.vlgmr.msra.gmra.mrb[18].mxu1 %vm1855_vm8, %v2019_v41  ;;  %v4534_v8 = vpop.eup %4533 }
 0x6f5   : > { %4241 = vmatpush3.bf16.msra.mxu1 %v5506_v14  ;;  %v1981_v21 = vpop.xlane.xlu1 %1980  ;;  %v2021_v48 = vmul.f32 %v4534_v8, %v5644_v37 }
 0x6f6   : > { %4545 = vrcp.f32 %v1981_v21  ;;  %4247 = vmatprep.subr.bf16.mxu1 %v5506_v14  ;;  %v1978_v42 = vpop.xlane.xlu0 %1977 }
 0x6f7   : > { %4547 = vrcp.f32 %v1978_v42 }
 0x6f8   : > { %v4536_v15 = vpop.eup %4535 }
 0x6f9   : > { %v4538_v45 = vpop.eup %4537  ;;  %v2020_v22 = vmul.f32 %v4536_v15, %v5650_v43 }
 0x6fa   : > { %v4540_v5 = vpop.eup %4539  ;;  %v2026_v37 = vmul.f32 %v4538_v45, %v5640_v29 }
 0x6fb   : > { %4084 = vmatprep.mubr.msk.f32.mxu0 %vm1855_vm8, %v2020_v22  ;;  %v2023_v51 = vmul.f32 %v4540_v5, %v5652_v12 }
 0x6fc   : > { %v4542_v36 = vpop.eup %4541  ;;  %4085 = vmatmul.mubr.msk.f32.vlgmr.msra.gmra.mrb[12].mxu0 %vm1855_vm8, %v2021_v48 }
 0x6fd   : > { %v1993_v49 = vpop.xlane.xlu1 %1992  ;;  %v2022_v50 = vmul.f32 %v4542_v36, %v5658_v46  ;;  %4245 = vmatpush3.bf16.msra.mxu0 %v5508_v17  ;;  %v4544_v53 = vpop.eup %4543 }
 0x6fe   : > { %4549 = vrcp.f32 %v1993_v49  ;;  %v1990_v52 = vpop.xlane.xlu0 %1989  ;;  %4251 = vmatprep.subr.bf16.mxu0 %v5508_v17  ;;  %v2027_v12 = vmul.f32 %v4544_v53, %v5632_v19 }
 0x6ff   : > { %4551 = vrcp.f32 %v1990_v52  ;;  %4091 = vmatprep.mubr.msk.f32.mxu1 %vm1855_vm8, %v2022_v50 }
 0x700   : > { %v4546_v43 = vpop.eup %4545  ;;  %4092 = vmatmul.mubr.msk.f32.vlgmr.msra.gmra.mrb[20].mxu1 %vm1855_vm8, %v2023_v51 }
 0x701   : > { %v4548_v24 = vpop.eup %4547  ;;  %4249 = vmatpush3.bf16.msra.mxu1 %v5506_v14  ;;  %v1999_v46 = vpop.xlane.xlu1 %1998  ;;  %4105 = vmatprep.mubr.msk.f32.mxu1 %vm1855_vm8, %v2026_v37  ;;  %v2025_v35 = vmul.f32 %v4546_v43, %v5666_v32 }
 0x702   : > { %4553 = vrcp.f32 %v1999_v46  ;;  %4255 = vmatprep.subr.bf16.mxu1 %v5506_v14  ;;  %v1996_v56 = vpop.xlane.xlu0 %1995  ;;  %v2024_v58 = vmul.f32 %v4548_v24, %v5668_v60 }
 0x703   : > { %4555 = vrcp.f32 %v1996_v56 }
 0x704   : > { %4098 = vmatprep.mubr.msk.f32.mxu0 %vm1855_vm8, %v2024_v58  ;;  %4106 = vmatmul.mubr.msk.f32.vlgmr.msra.gmra.mrb[22].mxu1 %vm1855_vm8, %v2027_v12 }
 0x705   : > { %4257 = vmatpush3.bf16.msra.mxu1 %v5506_v14  ;;  %4099 = vmatmul.mubr.msk.f32.vlgmr.msra.gmra.mrb[14].mxu0 %vm1855_vm8, %v2025_v35 }
 0x706   : > { %4253 = vmatpush3.bf16.msra.mxu0 %v5508_v17  ;;  %v4445_v17 = vld [vmem:[%s5382_s25] sm:$0xff]  }
 0x707   : > { %4122 = vmatprep.subr.bf16.mxu0 %v4445_v17 }
 0x708   : > { %v4550_v19 = vpop.eup %4549 }
 0x709   : > { %v4552_v29 = vpop.eup %4551  ;;  %v2029_v60 = vmul.f32 %v4550_v19, %v5674_v38  ;;  %v4446_v38 = vld [vmem:[%s5382_s25 + $0x8] sm:$0xff]  }
 0x70a   : > { %v2028_v33 = vmul.f32 %v4552_v29, %v5676_v63  ;;  %v4447_v63 = vld [vmem:[%s5382_s25 + $0x10] sm:$0xff]  }
 0x70c   : > { %v4554_v32 = vpop.eup %4553  ;;  %4112 = vmatprep.mubr.msk.f32.mxu0 %vm1855_vm8, %v2028_v33  ;;  %v2728_v33 = vsub.s32 1, %v5446_v0 }
 0x70d   : > { %v4556_v61 = vpop.eup %4555  ;;  %4113 = vmatmul.mubr.msk.f32.vlgmr.msra.gmra.mrb[16].mxu0 %vm1855_vm8, %v2029_v60  ;;  %v2031_v62 = vmul.f32 %v4554_v32, %v5682_v1  ;;  %v4450_v1 = vld [vmem:[%s5382_s25 + $0x28] sm:$0xff]  }
 0x70e   : > { %v2030_v14 = vmul.f32 %v4556_v61, %v5684_v13  ;;  %4123 = vmatpush3.bf16.msra.mxu0 %v4445_v17  ;;  %v4451_v13 = vld [vmem:[%s5382_s25 + $0x30] sm:$0xff]   ;;  %v2729_v60 = vrot.slane %v5460_v16, %v2728_v33  ;;  %v2878_v33 = vsub.s32 2, %v5446_v0 }
 0x70f   : > { %4124 = vmatprep.subr.bf16.mxu0 %v4446_v38 }
 0x710   : > { %4119 = vmatprep.mubr.msk.f32.mxu1 %vm1855_vm8, %v2030_v14 }
 0x711   : > { %4120 = vmatmul.mubr.msk.f32.vlgmr.msra.gmra.mrb[24].mxu1 %vm1855_vm8, %v2031_v62 }
 0x712   : > { %3030 = vmatprep.mubr.bf16.mxu1 %v4964_v34  ;;  %4125 = vmatpush3.bf16.msra.mxu0 %v4446_v38 }
 0x713   : > { %4126 = vmatprep.subr.bf16.mxu0 %v4447_v63 }
 0x716   : > { %4127 = vmatpush3.bf16.msra.mxu0 %v4447_v63 }
 0x717   : > { %4128 = vmatprep.subr.bf16.mxu0 %v4448_v40 }
 0x71a   : > { %4129 = vmatpush3.bf16.msra.mxu0 %v4448_v40 }
 0x71b   : > { %4130 = vmatprep.subr.bf16.mxu0 %v4449_v47 }
 0x71e   : > { %4131 = vmatpush3.bf16.msra.mxu0 %v4449_v47 }
 0x71f   : > { %4132 = vmatprep.subr.bf16.mxu0 %v4450_v1 }
 0x722   : > { %4133 = vmatpush3.bf16.msra.mxu0 %v4450_v1  ;;  %v4590_v1 = vld [vmem:[#allocation2 + $0x8] sm:$0xff] }
 0x723   : > { %4134 = vmatprep.subr.bf16.mxu0 %v4451_v13 }
 0x726   : > { %4135 = vmatpush3.bf16.msra.mxu0 %v4451_v13 }
 0x727   : > { %4136 = vmatprep.subr.bf16.mxu0 %v4452_v2 }
 0x72a   : > { %4137 = vmatpush3.bf16.msra.mxu0 %v4452_v2  ;;  %v4591_v2 = vld [vmem:[#allocation2 + $0x10] sm:$0xff] }
 0x7bb   : > { %v4072_v54 = vpop.f32.mrb[16].mxu1 }
 0x7bc   : > { %v2104_v6 = vpop.f32.mrb[17].mxu1  ;;  %v2681_v10 = vmul.f32 %v4072_v54, %v5469_v23  ;;  %v4592_v54 = vld [vmem:[#allocation2 + $0x18] sm:$0xff] }
 0x7bd   : > { %v2680_v18 = vmul.f32 %v2104_v6, %v5469_v23 }
 0x7c7   : > { %v4079_v7 = vpop.f32.mrb[18].mxu1 }
 0x7c8   : > { %v2185_v9 = vpop.f32.mrb[19].mxu1  ;;  %v2683_v4 = vmul.f32 %v4079_v7, %v5469_v23  ;;  %v4453_v7 = vld [vmem:[%s5384_s1] ss:$8 sps:$4 sm:$0xff]  }
 0x7c9   : > { %v2682_v55 = vmul.f32 %v2185_v9, %v5469_v23  ;;  %v4455_v9 = vld [vmem:[%s5384_s1 + $0x4] ss:$8 sps:$4 sm:$0xff]  }
 0x7ca   : > { %2998 = vmatprep.subr.bf16.mxu1 %v4455_v9 }
 0x7cb   : > { %2999 = vmatpush1.bf16.msra.mxu1 %v4453_v7 }
 0x7cf   : > { %v4086_v57 = vpop.f32.mrb[12].mxu0 }
 0x7d0   : > { %v2685_v11 = vmul.f32 %v4086_v57, %v5478_v27  ;;  %v2266_v59 = vpop.f32.mrb[13].mxu0  ;;  %v4458_v57 = vld [vmem:[%s5384_s1 + $0x14] ss:$8 sps:$4 sm:$0xff]  }
 0x7d1   : > { %v2684_v20 = vmul.f32 %v2266_v59, %v5478_v27  ;;  %3000 = vmatprep.subr.bf16.mxu1 %v4458_v57 }
 0x7d2   : > { %v2699_v25 = vadd.f32 %v2685_v11, %v2681_v10  ;;  %v4456_v10 = vld [vmem:[%s5384_s1 + $0x10] ss:$8 sps:$4 sm:$0xff]  }
 0x7d3   : > { %v4093_v3 = vpop.f32.mrb[20].mxu1  ;;  %v2696_v30 = vadd.f32 %v2684_v20, %v2680_v18  ;;  %3001 = vmatpush1.bf16.msra.mxu1 %v4456_v10 }
 0x7d4   : > { %v2687_v31 = vmul.f32 %v4093_v3, %v5478_v27  ;;  %v2347_v39 = vpop.f32.mrb[21].mxu1 }
 0x7d5   : > { %v2686_v44 = vmul.f32 %v2347_v39, %v5478_v27 }
 0x7d6   : > { %v2705_v41 = vadd.f32 %v2687_v31, %v2683_v4 }
 0x7d7   : > { %v2702_v21 = vadd.f32 %v2686_v44, %v2682_v55  ;;  %v4107_v42 = vpop.f32.mrb[22].mxu1 }
 0x7d8   : > { %v2691_v8 = vmul.f32 %v4107_v42, %v5475_v26  ;;  %v4100_v15 = vpop.f32.mrb[14].mxu0  ;;  %v2509_v45 = vpop.f32.mrb[23].mxu1 }
 0x7d9   : > { %v2689_v22 = vmul.f32 %v4100_v15, %v5475_v26  ;;  %v2690_v5 = vmul.f32 %v2509_v45, %v5475_v26  ;;  %v2428_v48 = vpop.f32.mrb[15].mxu0  ;;  %v4461_v15 = vld [vmem:[%s5384_s1 + $0x24] ss:$8 sps:$4 sm:$0xff]   ;;  %v4459_v45 = vld [vmem:[%s5384_s1 + $0x20] ss:$8 sps:$4 sm:$0xff]  }
 0x7da   : > { %v2706_v36 = vadd.f32 %v2705_v41, %v2691_v8  ;;  %v2688_v49 = vmul.f32 %v2428_v48, %v5475_v26  ;;  %3002 = vmatprep.subr.bf16.mxu1 %v4461_v15  ;;  %v4467_v48 = vld [vmem:[%s5384_s1 + $0x44] ss:$8 sps:$4 sm:$0xff]   ;;  %v2912_v15 = vsub.s32 4, %v5446_v0 }
 0x7db   : > { %v2700_v50 = vadd.f32 %v2699_v25, %v2689_v22  ;;  %v2703_v51 = vadd.f32 %v2702_v21, %v2690_v5  ;;  %3003 = vmatpush1.bf16.msra.mxu1 %v4459_v45  ;;  %v4464_v22 = vld [vmem:[%s5384_s1 + $0x34] ss:$8 sps:$4 sm:$0xff]   ;;  %v4462_v5 = vld [vmem:[%s5384_s1 + $0x30] ss:$8 sps:$4 sm:$0xff]  }
 0x7dc   : > { %v2697_v23 = vadd.f32 %v2696_v30, %v2688_v49  ;;  %3004 = vmatprep.subr.bf16.mxu1 %v4464_v22  ;;  %v4470_v49 = vld [vmem:[%s5384_s1 + $0x54] ss:$8 sps:$4 sm:$0xff]  }
 0x7dd   : > { %v4594_v22 = vld [vmem:[%s5401_s18 + $0x8] sm:$0xff] }
 0x7df   : > { %3005 = vmatpush1.bf16.msra.mxu1 %v4462_v5  ;;  %v2917_v5 = vrot.slane %v4594_v22, %v2912_v15 }
 0x7e0   : > { %v4114_v52 = vpop.f32.mrb[16].mxu0  ;;  %3006 = vmatprep.subr.bf16.mxu1 %v4467_v48 }
 0x7e1   : > { %v2693_v27 = vmul.f32 %v4114_v52, %v5481_v28  ;;  %v2590_v53 = vpop.f32.mrb[17].mxu0  ;;  %v4476_v52 = vld [vmem:[%s5384_s1 + $0x74] ss:$8 sps:$4 sm:$0xff]  }
 0x7e2   : > { %v2692_v37 = vmul.f32 %v2590_v53, %v5481_v28 }
 0x7e3   : > { %v2701_v43 = vadd.f32 %v2700_v50, %v2693_v27  ;;  %v4468_v50 = vld [vmem:[%s5384_s1 + $0x50] ss:$8 sps:$4 sm:$0xff]  }
 0x7e4   : > { %v2698_v24 = vadd.f32 %v2697_v23, %v2692_v37  ;;  %v4121_v46 = vpop.f32.mrb[24].mxu1  ;;  %v4473_v23 = vld [vmem:[%s5384_s1 + $0x64] ss:$8 sps:$4 sm:$0xff]   ;;  %v4474_v27 = vld [vmem:[%s5384_s1 + $0x70] ss:$8 sps:$4 sm:$0xff]  }
 0x7e5   : > { %v2695_v12 = vmul.f32 %v4121_v46, %v5481_v28  ;;  %v2671_v56 = vpop.f32.mrb[25].mxu1 }
 0x7e6   : > { %v2694_v58 = vmul.f32 %v2671_v56, %v5481_v28  ;;  %v2708_v35 = vpack.c.bf16 %v2701_v43, %v2698_v24  ;;  %v4589_v28 = vld [vmem:[#allocation2] sm:$0xff] }
 0x7e7   : > { %v2707_v19 = vadd.f32 %v2706_v36, %v2695_v12  ;;  %v4465_v36 = vld [vmem:[%s5384_s1 + $0x40] ss:$8 sps:$4 sm:$0xff]  }
 0x7e8   : > { %v2704_v26 = vadd.f32 %v2703_v51, %v2694_v58  ;;  %4138 = vmatprep.mubr.bf16.mxu0 %v2708_v35  ;;  %3007 = vmatpush1.bf16.msra.mxu1 %v4465_v36  ;;  %v4471_v51 = vld [vmem:[%s5384_s1 + $0x60] ss:$8 sps:$4 sm:$0xff]  }
 0x7e9   : > { %3008 = vmatprep.subr.bf16.mxu1 %v4470_v49 }
 0x7ea   : > { %v2709_v29 = vpack.c.bf16 %v2707_v19, %v2704_v26 }
 0x7ec   : > { %4139 = vmatmul.mubr.bf16.vlgmr.msra.gmra.mrb[20].mxu0 %v2709_v29  ;;  %3009 = vmatpush1.bf16.msra.mxu1 %v4468_v50 }
 0x7ed   : > { %3010 = vmatprep.subr.bf16.mxu1 %v4473_v23 }
 0x7f0   : > { %3011 = vmatpush1.bf16.msra.mxu1 %v4471_v51 }
 0x7f1   : > { %3012 = vmatprep.subr.bf16.mxu1 %v4476_v52 }
 0x7f4   : > { %3013 = vmatpush1.bf16.msra.mxu1 %v4474_v27 }
 0x8bf   : > { %v4140_v32 = vpop.f32.mrb[20].mxu0 }
 0x8c0   : > { %v2812_v61 = vpop.f32.mrb[21].mxu0  ;;  %v2821_v38 = vadd.f32 %v4140_v32, %v2729_v60 }
 0x8c1   : > { %v2813_v14 = vadd.f32 %v2812_v61, %v2729_v60  ;;  %v4141_v62 = vpop.f32.mrb[22].mxu0  ;;  %v2886_v61 = vsub.s32 3, %v5446_v0 }
 0x8c2   : > { %v2815_v17 = vpop.f32.mrb[23].mxu0  ;;  %v2824_v47 = vadd.f32 %v4141_v62, %v2729_v60  ;;  %v2829_v16 = vadd.f32 %v4591_v2, %v2821_v38 }
 0x8c3   : > { %v2816_v63 = vadd.f32 %v2815_v17, %v2729_v60  ;;  %v2827_v40 = vadd.f32 %v4589_v28, %v2813_v14  ;;  %v5781_v60 = vld [vmem:[%s5401_s18] sm:$0xff] }
 0x8c4   : > { %v2830_v6 = vadd.f32 %v4592_v54, %v2824_v47  ;;  %v2879_v32 = vrot.slane %v5781_v60, %v2878_v33  ;;  %v2887_v28 = vrot.slane %v5781_v60, %v2886_v61  ;;  %v2913_v45 = vrot.slane %v5781_v60, %v2912_v15 }
 0x8c5   : > { %2831 = vadd.xlane.f32.xlu0 %v2827_v40  ;;  %v2828_v13 = vadd.f32 %v4590_v1, %v2816_v63 }
 0x8c7   : > { %2833 = vadd.xlane.f32.xlu1 %v2828_v13 }
 0x8c9   : > { %2835 = vadd.xlane.f32.xlu0 %v2829_v16 }
 0x8cb   : > { %2837 = vadd.xlane.f32.xlu1 %v2830_v6 }
 0x952   : > { %v2832_v11 = vpop.xlane.xlu0 %2831 }
 0x953   : > { %v2840_v59 = vmul.f32 0.0078125, %v2832_v11 }
 0x954   : > { %v2834_v18 = vpop.xlane.xlu1 %2833 }
 0x955   : > { %v2844_v20 = vsub.f32 %v2827_v40, %v2840_v59  ;;  %v2841_v25 = vmul.f32 0.0078125, %v2834_v18  ;;  %v4477_v59 = vld [vmem:[%s5390_s5 + $0x40] sm:$0xff]  }
 0x956   : > { %v2836_v3 = vpop.xlane.xlu0 %2835  ;;  %v4478_v18 = vld [vmem:[%s5390_s5] sm:$0xff]   ;;  %3915 = vmatprep.subr.bf16.mxu0 %v4477_v59 }
 0x957   : > { %v2845_v4 = vsub.f32 %v2828_v13, %v2841_v25  ;;  %v2842_v30 = vmul.f32 0.0078125, %v2836_v3  ;;  %v2848_v31 = vmul.f32 %v2844_v20, %v2844_v20  ;;  %3916 = vmatpush3.bf16.msra.mxu0 %v4478_v18  ;;  %v4480_v25 = vld [vmem:[%s5390_s5 + $0x8] sm:$0xff]   ;;  %v4482_v3 = vld [vmem:[%s5390_s5 + $0x10] sm:$0xff]  }
 0x958   : > { %v2838_v39 = vpop.xlane.xlu1 %2837 }
 0x959   : > { %v5763_v55 = vsub.f32 %v2829_v16, %v2842_v30  ;;  %v2843_v44 = vmul.f32 0.0078125, %v2838_v39  ;;  %2852 = vadd.xlane.f32.xlu0 %v2848_v31  ;;  %v2849_v41 = vmul.f32 %v2845_v4, %v2845_v4  ;;  %v4484_v30 = vld [vmem:[%s5390_s5 + $0x18] sm:$0xff]   ;;  %v4485_v31 = vld [vmem:[%s5390_s5 + $0x60] sm:$0xff]  }
 0x95a   : > { %v4486_v39 = vld [vmem:[%s5390_s5 + $0x20] sm:$0xff]  }
 0x95b   : > { %v2847_v21 = vsub.f32 %v2830_v6, %v2843_v44  ;;  %2854 = vadd.xlane.f32.xlu1 %v2849_v41  ;;  %v2850_v42 = vmul.f32 %v5763_v55, %v5763_v55  ;;  %v4488_v44 = vld [vmem:[%s5390_s5 + $0x28] sm:$0xff]   ;;  %v4489_v41 = vld [vmem:[%s5390_s5 + $0x70] sm:$0xff]  }
 0x95d   : > { %2856 = vadd.xlane.f32.xlu0 %v2850_v42  ;;  %v2851_v8 = vmul.f32 %v2847_v21, %v2847_v21  ;;  %v4491_v42 = vld [vmem:[%s5390_s5 + $0x78] sm:$0xff]  }
 0x95f   : > { %2858 = vadd.xlane.f32.xlu1 %v2851_v8  ;;  %v4492_v8 = vld [vmem:[%s5390_s5 + $0x38] sm:$0xff]  }
 0x9e6   : > { %v2853_v53 = vpop.xlane.xlu0 %2852 }
 0x9e7   : > { %v2860_v37 = vmul.f32 0.0078125, %v2853_v53 }
 0x9e8   : > { %v2855_v43 = vpop.xlane.xlu1 %2854 }
 0x9e9   : > { %v2864_v24 = vadd.f32 1e-12, %v2860_v37  ;;  %v2861_v46 = vmul.f32 0.0078125, %v2855_v43 }
 0x9ea   : > { %v2857_v12 = vpop.xlane.xlu0 %2856 }
 0x9eb   : > { %4557 = vrsqrt.f32 %v2864_v24  ;;  %v2865_v56 = vadd.f32 1e-12, %v2861_v46  ;;  %v2862_v58 = vmul.f32 0.0078125, %v2857_v12 }
 0x9ec   : > { %v2859_v35 = vpop.xlane.xlu1 %2858 }
 0x9ed   : > { %4559 = vrsqrt.f32 %v2865_v56  ;;  %v2866_v19 = vadd.f32 1e-12, %v2862_v58  ;;  %v2863_v26 = vmul.f32 0.0078125, %v2859_v35 }
 0x9ef   : > { %4561 = vrsqrt.f32 %v2866_v19  ;;  %v2867_v29 = vadd.f32 1e-12, %v2863_v26 }
 0x9f1   : > { %4563 = vrsqrt.f32 %v2867_v29 }
 0x9f5   : > { %v4558_v14 = vpop.eup %4557 }
 0x9f6   : > { %v2872_v62 = vmul.f32 %v4558_v14, %v2844_v20  ;;  %v4479_v20 = vld [vmem:[%s5390_s5 + $0x48] sm:$0xff]  }
 0x9f7   : > { %v4560_v17 = vpop.eup %4559  ;;  %3917 = vmatprep.subr.bf16.mxu0 %v4479_v20 }
 0x9f8   : > { %v2873_v38 = vmul.f32 %v4560_v17, %v2845_v4  ;;  %v2880_v63 = vmul.f32 %v2879_v32, %v2872_v62  ;;  %3918 = vmatpush3.bf16.msra.mxu0 %v4480_v25  ;;  %v4483_v4 = vld [vmem:[%s5390_s5 + $0x58] sm:$0xff]  }
 0x9f9   : > { %v4562_v40 = vpop.eup %4561 }
 0x9fa   : > { %v2881_v47 = vmul.f32 %v2879_v32, %v2873_v38  ;;  %v5786_v13 = vadd.f32 %v2887_v28, %v2880_v63  ;;  %v2874_v16 = vmul.f32 %v4562_v40, %v5763_v55  ;;  %v4487_v55 = vld [vmem:[%s5390_s5 + $0x68] sm:$0xff]  }
 0x9fb   : > { %v4564_v1 = vpop.eup %4563 }
 0x9fc   : > { %v5788_v2 = vadd.f32 %v2887_v28, %v2881_v47  ;;  %v2875_v54 = vmul.f32 %v4564_v1, %v2847_v21  ;;  %v2882_v9 = vmul.f32 %v2879_v32, %v2874_v16  ;;  %v4490_v21 = vld [vmem:[%s5390_s5 + $0x30] sm:$0xff]  }
 0x9fe   : > { %v2892_v6 = vpack.c.bf16 %v5788_v2, %v5786_v13  ;;  %v2883_v7 = vmul.f32 %v2879_v32, %v2875_v54  ;;  %v5796_v10 = vadd.f32 %v2887_v28, %v2882_v9 }
 0xa00   : > { %3031 = vmatmul.mubr.bf16.vlgmr.msra.gmra.mrb[28].mxu1 %v2892_v6  ;;  %v5794_v57 = vadd.f32 %v2887_v28, %v2883_v7 }
 0xa01   : > { %3040 = vmatprep.mubr.bf16.mxu1 %v4964_v34  ;;  %v4481_v34 = vld [vmem:[%s5390_s5 + $0x50] sm:$0xff]  }
 0xa02   : > { %v2893_v11 = vpack.c.bf16 %v5794_v57, %v5796_v10  ;;  %3919 = vmatprep.subr.bf16.mxu0 %v4481_v34 }
 0xa03   : > { %3920 = vmatpush3.bf16.msra.mxu0 %v4482_v3 }
 0xa04   : > { %3921 = vmatprep.subr.bf16.mxu0 %v4483_v4 }
 0xa07   : > { %3922 = vmatpush3.bf16.msra.mxu0 %v4484_v30 }
 0xa08   : > { %3041 = vmatmul.mubr.bf16.gmra.mrb[32].mxu1 %v2893_v11  ;;  %3923 = vmatprep.subr.bf16.mxu0 %v4485_v31 }
 0xa0b   : > { %3924 = vmatpush3.bf16.msra.mxu0 %v4486_v39 }
 0xa0c   : > { %3925 = vmatprep.subr.bf16.mxu0 %v4487_v55 }
 0xa0f   : > { %3926 = vmatpush3.bf16.msra.mxu0 %v4488_v44 }
 0xa10   : > { %3927 = vmatprep.subr.bf16.mxu0 %v4489_v41 }
 0xa13   : > { %3928 = vmatpush3.bf16.msra.mxu0 %v4490_v21 }
 0xa14   : > { %3929 = vmatprep.subr.bf16.mxu0 %v4491_v42 }
 0xa17   : > { %3930 = vmatpush3.bf16.msra.mxu0 %v4492_v8 }
 0xad3   : > { %v3032_v48 = vpop.f32.mrb[28].mxu1 }
 0xad4   : > { %v5819_v36 = vadd.f32 %v3032_v48, %v2913_v45  ;;  %v3034_v49 = vpop.f32.mrb[29].mxu1 }
 0xad5   : > { %v5821_v50 = vadd.f32 %v3034_v49, %v2917_v5  ;;  %v3036_v51 = vpop.f32.mrb[30].mxu1 }
 0xad6   : > { %v3059_v23 = vmul.f32 0.044715, %v5819_v36  ;;  %v5824_v52 = vadd.f32 %v3036_v51, %v2913_v45  ;;  %v3038_v27 = vpop.f32.mrb[31].mxu1 }
 0xad7   : > { %v3060_v53 = vmul.f32 0.044715, %v5821_v50  ;;  %v5827_v37 = vadd.f32 %v3038_v27, %v2917_v5  ;;  %v3051_v27 = vmul.f32 0.5, %v5819_v36 }
 0xad8   : > { %v3067_v43 = vmul.f32 %v3059_v23, %v5819_v36  ;;  %v3061_v24 = vmul.f32 0.044715, %v5824_v52 }
 0xad9   : > { %v3068_v46 = vmul.f32 %v3060_v53, %v5821_v50  ;;  %v3062_v12 = vmul.f32 0.044715, %v5827_v37  ;;  %v3053_v53 = vmul.f32 0.5, %v5824_v52 }
 0xada   : > { %v3075_v56 = vmul.f32 %v3067_v43, %v5819_v36  ;;  %v3069_v58 = vmul.f32 %v3061_v24, %v5824_v52  ;;  %v3052_v24 = vmul.f32 0.5, %v5821_v50 }
 0xadb   : > { %v3076_v35 = vmul.f32 %v3068_v46, %v5821_v50  ;;  %v3070_v19 = vmul.f32 %v3062_v12, %v5827_v37  ;;  %v3042_v26 = vpop.f32.mrb[32].mxu1  ;;  %v3054_v46 = vmul.f32 0.5, %v5827_v37 }
 0xadc   : > { %v3083_v29 = vadd.f32 %v3075_v56, %v5819_v36  ;;  %v3077_v33 = vmul.f32 %v3069_v58, %v5824_v52  ;;  %v5839_v32 = vadd.f32 %v3042_v26, %v2913_v45  ;;  %v3044_v61 = vpop.f32.mrb[33].mxu1 }
 0xadd   : > { %v3078_v14 = vmul.f32 %v3070_v19, %v5827_v37  ;;  %v5842_v62 = vadd.f32 %v3044_v61, %v2917_v5  ;;  %v3046_v17 = vpop.f32.mrb[34].mxu1  ;;  %v3084_v38 = vadd.f32 %v3076_v35, %v5821_v50 }
 0xade   : > { %v3091_v63 = vmul.f32 0.7978846, %v3083_v29  ;;  %v3085_v28 = vadd.f32 %v3077_v33, %v5824_v52  ;;  %v3063_v40 = vmul.f32 0.044715, %v5839_v32  ;;  %v3047_v47 = vadd.f32 %v3046_v17, %v2913_v45  ;;  %v3048_v1 = vpop.f32.mrb[35].mxu1 }
 0xadf   : > { %v3064_v16 = vmul.f32 0.044715, %v5842_v62  ;;  %v3049_v54 = vadd.f32 %v3048_v1, %v2917_v5  ;;  %v3086_v6 = vadd.f32 %v3078_v14, %v5827_v37  ;;  %v3092_v7 = vmul.f32 0.7978846, %v3084_v38 }
 0xae0   : > { %4565 = vtanh.f32 %v3091_v63  ;;  %v3093_v9 = vmul.f32 0.7978846, %v3085_v28  ;;  %v3071_v11 = vmul.f32 %v3063_v40, %v5839_v32  ;;  %v3065_v59 = vmul.f32 0.044715, %v3047_v47 }
 0xae1   : > { %v3072_v18 = vmul.f32 %v3064_v16, %v5842_v62  ;;  %v3066_v20 = vmul.f32 0.044715, %v3049_v54  ;;  %v3094_v25 = vmul.f32 0.7978846, %v3086_v6  ;;  %4567 = vtanh.f32 %v3092_v7 }
 0xae2   : > { %4569 = vtanh.f32 %v3093_v9  ;;  %v3079_v34 = vmul.f32 %v3071_v11, %v5839_v32  ;;  %v3073_v3 = vmul.f32 %v3065_v59, %v3047_v47  ;;  %v3055_v52 = vmul.f32 0.5, %v5839_v32 }
 0xae3   : > { %v3080_v4 = vmul.f32 %v3072_v18, %v5842_v62  ;;  %v3074_v30 = vmul.f32 %v3066_v20, %v3049_v54  ;;  %4571 = vtanh.f32 %v3094_v25  ;;  %v3057_v50 = vmul.f32 0.5, %v3047_v47 }
 0xae4   : > { %v3081_v31 = vmul.f32 %v3073_v3, %v3047_v47  ;;  %v3087_v39 = vadd.f32 %v3079_v34, %v5839_v32  ;;  %v3056_v37 = vmul.f32 0.5, %v5842_v62  ;;  %v3058_v28 = vmul.f32 0.5, %v3049_v54 }
 0xae5   : > { %v3082_v55 = vmul.f32 %v3074_v30, %v3049_v54  ;;  %v3088_v44 = vadd.f32 %v3080_v4, %v5842_v62  ;;  %v3161_v59 = vsub.s32 5, %v5446_v0 }
 0xae6   : > { %v3089_v41 = vadd.f32 %v3081_v31, %v3047_v47  ;;  %v3095_v21 = vmul.f32 0.7978846, %v3087_v39 }
 0xae7   : > { %v3090_v42 = vadd.f32 %v3082_v55, %v3049_v54  ;;  %v3096_v8 = vmul.f32 0.7978846, %v3088_v44  ;;  %v3162_v20 = vrot.slane %v5781_v60, %v3161_v59 }
 0xae8   : > { %v3097_v15 = vmul.f32 0.7978846, %v3089_v41  ;;  %4573 = vtanh.f32 %v3095_v21 }
 0xae9   : > { %v3098_v45 = vmul.f32 0.7978846, %v3090_v42  ;;  %4575 = vtanh.f32 %v3096_v8 }
 0xaea   : > { %v4566_v22 = vpop.eup %4565  ;;  %4577 = vtanh.f32 %v3097_v15 }
 0xaeb   : > { %v4568_v5 = vpop.eup %4567  ;;  %v3107_v48 = vadd.f32 1.0, %v4566_v22  ;;  %4579 = vtanh.f32 %v3098_v45 }
 0xaec   : > { %v4570_v49 = vpop.eup %4569  ;;  %v3108_v51 = vadd.f32 1.0, %v4568_v5 }
 0xaed   : > { %v4572_v23 = vpop.eup %4571  ;;  %v3109_v43 = vadd.f32 1.0, %v4570_v49  ;;  %v3115_v56 = vmul.f32 %v3107_v48, %v3051_v27 }
 0xaee   : > { %v3110_v12 = vadd.f32 1.0, %v4572_v23  ;;  %v3116_v35 = vmul.f32 %v3108_v51, %v3052_v24 }
 0xaef   : > { %v3117_v58 = vmul.f32 %v3109_v43, %v3053_v53 }
 0xaf0   : > { %v3118_v19 = vmul.f32 %v3110_v12, %v3054_v46 }
 0xaf1   : > { %v3123_v26 = vpack.c.bf16 %v3117_v58, %v3115_v56 }
 0xaf2   : > { %v4574_v29 = vpop.eup %4573  ;;  %v3124_v33 = vpack.c.bf16 %v3118_v19, %v3116_v35 }
 0xaf3   : > { %v4576_v61 = vpop.eup %4575  ;;  %v3111_v14 = vadd.f32 1.0, %v4574_v29 }
 0xaf4   : > { %v4578_v17 = vpop.eup %4577  ;;  %3291 = vmatprep.mubr.bf16.mxu0 %v3124_v33  ;;  %v3112_v36 = vadd.f32 1.0, %v4576_v61 }
 0xaf5   : > { %v4580_v38 = vpop.eup %4579  ;;  %3292 = vmatmul.mubr.bf16.vlgmr.msra.gmra.mrb[24].mxu0 %v3123_v26  ;;  %v3113_v63 = vadd.f32 1.0, %v4578_v17  ;;  %v3119_v1 = vmul.f32 %v3111_v14, %v3055_v52  ;;  %v3358_v14 = vsub.s32 6, %v5446_v0  ;;  %v3366_v52 = vsub.s32 7, %v5446_v0 }
 0xaf6   : > { %v3114_v40 = vadd.f32 1.0, %v4580_v38  ;;  %v3120_v6 = vmul.f32 %v3112_v36, %v3056_v37 }
 0xaf7   : > { %v3121_v16 = vmul.f32 %v3113_v63, %v3057_v50  ;;  %v3359_v63 = vrot.slane %v5781_v60, %v3358_v14 }
 0xaf8   : > { %v3122_v7 = vmul.f32 %v3114_v40, %v3058_v28  ;;  %v3367_v28 = vrot.slane %v5781_v60, %v3366_v52  ;;  %v4595_v60 = vld [vmem:[#allocation16] sm:$0xff] (!%p3794_p11)  }
 0xaf9   : > { %v3125_v9 = vpack.c.bf16 %v3121_v16, %v3119_v1 }
 0xafa   : > { %v3126_v11 = vpack.c.bf16 %v3122_v7, %v3120_v6 }
 0xafc   : > { %3299 = vmatprep.mubr.bf16.mxu0 %v3126_v11 }
 0xafd   : > { %3300 = vmatmul.mubr.bf16.gmra.mrb[28].mxu0 %v3125_v9 }
 0xbc8   : > { %v3931_v18 = vpop.f32.mrb[24].mxu0 }
 0xbc9   : > { %v3932_v32 = vpop.f32.mrb[25].mxu0 }
 0xbca   : > { %v3933_v47 = vadd.f32 %v3932_v32, %v3931_v18  ;;  %v3934_v25 = vpop.f32.mrb[26].mxu0 }
 0xbcb   : > { %v3935_v34 = vpop.f32.mrb[27].mxu0 }
 0xbcc   : > { %v3294_v62 = vadd.f32 %v3933_v47, %v3162_v20  ;;  %v3936_v54 = vadd.f32 %v3935_v34, %v3934_v25 }
 0xbce   : > { %v3297_v3 = vadd.f32 %v3936_v54, %v3162_v20  ;;  %v3308_v4 = vadd.f32 %v3294_v62, %v5786_v13  ;;  %v4967_v62 = vmov (!%p3794_p11), 0.0   ;;  %v4596_v54 = vld [vmem:[#allocation16 + $0x8] sm:$0xff] (!%p3794_p11)  }
 0xbcf   : > { %4142 = vmatprep.subr.bf16.mxu0 (!%p3794_p11), %v4967_v62  ;;  %4158 = vmatprep.mubr.msk.bf16.mxu0 (!%p3794_p11), %vm4968_vm9, %v4967_v62 }
 0xbd0   : > { %3312 = vadd.xlane.f32.xlu0 %v3308_v4  ;;  %v3937_v30 = vpop.f32.mrb[28].mxu0  ;;  %v3309_v31 = vadd.f32 %v3297_v3, %v5788_v2  ;;  %4143 = vmatpush3.bf16.msra.mxu0 (!%p3794_p11), %v4595_v60  ;;  %v4597_v3 = vld [vmem:[#allocation16 + $0x10] sm:$0xff] (!%p3794_p11)  }
 0xbd1   : > { %v3938_v39 = vpop.f32.mrb[29].mxu0  ;;  %4144 = vmatprep.subr.bf16.mxu0 (!%p3794_p11), %v4967_v62 }
 0xbd2   : > { %v3939_v55 = vadd.f32 %v3938_v39, %v3937_v30  ;;  %3314 = vadd.xlane.f32.xlu1 %v3309_v31  ;;  %v3940_v44 = vpop.f32.mrb[30].mxu0  ;;  %v4599_v30 = vld [vmem:[#allocation16 + $0x20] sm:$0xff] (!%p3794_p11)   ;;  %v4601_v39 = vld [vmem:[#allocation16 + $0x30] sm:$0xff] (!%p3794_p11)  }
 0xbd3   : > { %v3941_v41 = vpop.f32.mrb[31].mxu0 }
 0xbd4   : > { %v3302_v21 = vadd.f32 %v3939_v55, %v3162_v20  ;;  %v3942_v42 = vadd.f32 %v3941_v41, %v3940_v44  ;;  %4145 = vmatpush3.bf16.msra.mxu0 (!%p3794_p11), %v4596_v54  ;;  %v4602_v55 = vld [vmem:[#allocation16 + $0x38] sm:$0xff] (!%p3794_p11)  }
 0xbd5   : > { %4146 = vmatprep.subr.bf16.mxu0 (!%p3794_p11), %v4967_v62 }
 0xbd6   : > { %v3305_v8 = vadd.f32 %v3942_v42, %v3162_v20  ;;  %v3310_v15 = vadd.f32 %v3302_v21, %v5796_v10  ;;  %v3795_v21 = vld [vmem:[#allocation18] ss:$0 sm:$0xff] (!%p3794_p11) }
 0xbd8   : > { %3316 = vadd.xlane.f32.xlu0 %v3310_v15  ;;  %v3311_v45 = vadd.f32 %v3305_v8, %v5794_v57  ;;  %4147 = vmatpush3.bf16.msra.mxu0 (!%p3794_p11), %v4597_v3 }
 0xbd9   : > { %4148 = vmatprep.subr.bf16.mxu0 (!%p3794_p11), %v4967_v62 }
 0xbda   : > { %3318 = vadd.xlane.f32.xlu1 %v3311_v45 }
 0xc5d   : > { %v3313_v22 = vpop.xlane.xlu0 %3312 }
 0xc5e   : > { %v3320_v13 = vmul.f32 0.0078125, %v3313_v22 }
 0xc5f   : > { %v3315_v5 = vpop.xlane.xlu1 %3314 }
 0xc60   : > { %v3324_v48 = vsub.f32 %v3308_v4, %v3320_v13  ;;  %v3321_v49 = vmul.f32 0.0078125, %v3315_v5  ;;  %v4598_v4 = vld [vmem:[#allocation16 + $0x18] sm:$0xff] (!%p3794_p11)  }
 0xc61   : > { %4149 = vmatpush3.bf16.msra.mxu0 (!%p3794_p11), %v4598_v4 }
 0xc62   : > { %v3325_v2 = vsub.f32 %v3309_v31, %v3321_v49  ;;  %v3328_v51 = vmul.f32 %v3324_v48, %v3324_v48  ;;  %4150 = vmatprep.subr.bf16.mxu0 (!%p3794_p11), %v4967_v62  ;;  %v4600_v31 = vld [vmem:[#allocation16 + $0x28] sm:$0xff] (!%p3794_p11)  }
 0xc64   : > { %3332 = vadd.xlane.f32.xlu0 %v3328_v51  ;;  %v3329_v23 = vmul.f32 %v3325_v2, %v3325_v2 }
 0xc65   : > { %v3317_v27 = vpop.xlane.xlu0 %3316  ;;  %4151 = vmatpush3.bf16.msra.mxu0 (!%p3794_p11), %v4599_v30 }
 0xc66   : > { %v3322_v53 = vmul.f32 0.0078125, %v3317_v27  ;;  %3334 = vadd.xlane.f32.xlu1 %v3329_v23  ;;  %4152 = vmatprep.subr.bf16.mxu0 (!%p3794_p11), %v4967_v62 }
 0xc67   : > { %v3319_v43 = vpop.xlane.xlu1 %3318 }
 0xc68   : > { %v3326_v24 = vsub.f32 %v3310_v15, %v3322_v53  ;;  %v3323_v46 = vmul.f32 0.0078125, %v3319_v43 }
 0xc69   : > { %4153 = vmatpush3.bf16.msra.mxu0 (!%p3794_p11), %v4600_v31 }
 0xc6a   : > { %v3327_v10 = vsub.f32 %v3311_v45, %v3323_v46  ;;  %v3330_v12 = vmul.f32 %v3326_v24, %v3326_v24  ;;  %4154 = vmatprep.subr.bf16.mxu0 (!%p3794_p11), %v4967_v62 }
 0xc6c   : > { %3336 = vadd.xlane.f32.xlu0 %v3330_v12  ;;  %v3331_v57 = vmul.f32 %v3327_v10, %v3327_v10 }
 0xc6d   : > { %4155 = vmatpush3.bf16.msra.mxu0 (!%p3794_p11), %v4601_v39 }
 0xc6e   : > { %3338 = vadd.xlane.f32.xlu1 %v3331_v57  ;;  %4156 = vmatprep.subr.bf16.mxu0 (!%p3794_p11), %v4967_v62 }
 0xc71   : > { %4157 = vmatpush3.bf16.msra.mxu0 (!%p3794_p11), %v4602_v55 }
 0xcf1   : > { %v3333_v56 = vpop.xlane.xlu0 %3332 }
 0xcf2   : > { %v3340_v58 = vmul.f32 0.0078125, %v3333_v56 }
 0xcf3   : > { %v3335_v35 = vpop.xlane.xlu1 %3334 }
 0xcf4   : > { %v3344_v19 = vadd.f32 1e-12, %v3340_v58  ;;  %v3341_v26 = vmul.f32 0.0078125, %v3335_v35 }
 0xcf6   : > { %4581 = vrsqrt.f32 %v3344_v19  ;;  %v3345_v29 = vadd.f32 1e-12, %v3341_v26 }
 0xcf8   : > { %4583 = vrsqrt.f32 %v3345_v29 }
 0xcf9   : > { %v3337_v33 = vpop.xlane.xlu0 %3336 }
 0xcfa   : > { %v3342_v61 = vmul.f32 0.0078125, %v3337_v33 }
 0xcfb   : > { %v3339_v17 = vpop.xlane.xlu1 %3338 }
 0xcfc   : > { %v3346_v36 = vadd.f32 1e-12, %v3342_v61  ;;  %v3343_v38 = vmul.f32 0.0078125, %v3339_v17 }
 0xcfe   : > { %4585 = vrsqrt.f32 %v3346_v36  ;;  %v3347_v50 = vadd.f32 1e-12, %v3343_v38 }
 0xd00   : > { %v4582_v37 = vpop.eup %4581  ;;  %4587 = vrsqrt.f32 %v3347_v50 }
 0xd01   : > { %v3352_v40 = vmul.f32 %v4582_v37, %v3324_v48 }
 0xd02   : > { %v4584_v1 = vpop.eup %4583 }
 0xd03   : > { %v3360_v16 = vmul.f32 %v3359_v63, %v3352_v40  ;;  %v3353_v6 = vmul.f32 %v4584_v1, %v3325_v2 }
 0xd05   : > { %v3368_v7 = vadd.f32 %v3367_v28, %v3360_v16  ;;  %v3361_v9 = vmul.f32 %v3359_v63, %v3353_v6 }
 0xd07   : > { %3372 = vst [vmem:[#allocation2] sm:$0xff] %v3368_v7  ;;  %v3369_v11 = vadd.f32 %v3367_v28, %v3361_v9 }
 0xd08   : > { %v4586_v59 = vpop.eup %4585 }
 0xd09   : > { %3373 = vst [vmem:[#allocation2 + $0x8] sm:$0xff] %v3369_v11  ;;  %v3354_v18 = vmul.f32 %v4586_v59, %v3326_v24 }
 0xd0a   : > { %v4588_v0 = vpop.eup %4587 }
 0xd0b   : > { %v3362_v20 = vmul.f32 %v3359_v63, %v3354_v18  ;;  %v3355_v32 = vmul.f32 %v4588_v0, %v3327_v10  ;;  %3379 = sbr.rel (%p3794_p11) target bundleno = 3579 (0xdfb), region = 112 }
 0xd0d   : > { %v3370_v47 = vadd.f32 %v3367_v28, %v3362_v20  ;;  %v3363_v25 = vmul.f32 %v3359_v63, %v3355_v32 }
 0xd0f   : > { %3374 = vst [vmem:[#allocation2 + $0x10] sm:$0xff] %v3370_v47  ;;  %v3371_v34 = vadd.f32 %v3367_v28, %v3363_v25 }
 0xd11   : > { %3375 = vst [vmem:[#allocation2 + $0x18] sm:$0xff] %v3371_v34 }
 0xd16   : > { %v3380_v44 = vld [vmem:[#allocation2] ss:$16 sm:$0x3] }
 0xd17   : > { %v3381_v41 = vpack.c.bf16 %v3380_v44, %v3380_v44 }
 0xd19   : > { %4159 = vmatmul.mubr.bf16.vlgmr.msra.gmra.mrb[0].mxu0 %v3381_v41 }
 0xdec   : > { %v3487_v42 = vpop.f32.mrb[0].mxu0 }
 0xded   : > { %v3488_v8 = vadd.f32 %v3795_v21, %v3487_v42  ;;  %v4160_v15 = vpop.f32.mrb[1].mxu0 }
 0xdee   : > { %v3490_v45 = vpop.f32.mrb[2].mxu0 }
 0xdef   : > { %4603 = vtanh.f32 %v3488_v8  ;;  %v4161_v22 = vpop.f32.mrb[3].mxu0 }
 0xdf9   : > { %v4604_v13 = vpop.eup %4603 }
 0xdfa   : > { %3494 = vst [vmem:[#allocation19] sm:$0x3] %v4604_v13 }
 0xdfb PF: > { %s6004_s30 = sld [smem:[#allocation28_spill]]  ;;  %s4969_s17 = smov [#allocation19]  }
 0xdfc   : > { %s3502_s9 = sshll.u32 %s4969_s17, 4  ;;  %s3503_s9 = int_to_ptr.vmem [resolvable:$true] %s3502_s9 }
 0xdfd   : > { %s4865_s25 = scalar_lea.vmem %s3503_s9, 32  ;;  %p4872_p5 = scmp.lt.s32.totalorder %s3503_s9, %s3503_s9 }
 0xdfe   : > { %p4866_p3 = scmp.ne.s32.totalorder %s3503_s9, %s4865_s25  ;;  %p4873_p6 = scmp.lt.s32.totalorder %s4865_s25, %s4865_s25 }
 0xe00   : > { %p4874_p8 = por %p4873_p6, %p4872_p5 }
 0xe01   : > { %p4350_p0 = scmp.eq.s32.totalorder %s6004_s30, 1 }
 0xe03   : > { %p4867_p4 = pnand %p4866_p3, %p4350_p0 }
 0xe05   : > { %p4868_p13 = pneg %p4867_p4 }
 0xe07   : > { %p4875_p1 = pnand %p4874_p8, %p4868_p13 }
 0xe09   : > { %4878 = shalt.err (!%p4875_p1)
}
 0xe0a   : > { %s6005_s5 = sld [smem:[#allocation39_spill]] }
 0xe10   : > { %s4879_s28 = scalar_lea.hbm %s6005_s5, 32 }
 0xe11   : > { %p4880_p10 = scmp.ne.s32.totalorder %s6005_s5, %s4879_s28  ;;  %p4885_p2 = scmp.lt.u32.totalorder %s4879_s28, %s6005_s5 }
 0xe13   : > { %p4881_p7 = pnand %p4880_p10, %p4350_p0 }
 0xe15   : > { %p4882_p9 = pneg %p4881_p7 }
 0xe17   : > { %p4887_p12 = pnand %p4885_p2, %p4882_p9 }
 0xe19   : > { %4890 = shalt.err (!%p4887_p12)
}
 0xe1a   : > { %4307 = dma.vmem_to_hbm [thread:$0]  (%p4350_p0), %s3503_s9, 32, %s6005_s5, [#allocation6]  }
 0xe1b   : > { %4928 = dma.done.wait (%p4350_p0), [#allocation6], 32  }
 0xe1c   : > { %4930 = vsyncadd (%p4350_p0), [#allocation6], 4294967264 }
 0xe1d PF: > { %s6006_s24 = sld [smem:[#allocation29_spill]]  ;;  %s6007_s21 = sld [smem:[#allocation26_spill]] }
 0xe1e   : > { %s6008_s22 = sld [smem:[#allocation27_spill]]  ;;  %s6009_s23 = sld [smem:[#allocation30_spill]] }
 0xe23   : > { %p29_p11 = scmp.ge.s32.totalorder %s6006_s24, 4  }
 0xe25   :  { %31 = sbr.rel (!%p29_p11) target bundleno = 18 (0x12), region = 172 }
 0xe2c   :  { %3515 = vsyncpa [#allocation5], 1 }
 0xe2d   :  { %3517 = vsyncpa [#allocation5 + $0x1], 1 }
 0xe2e   :  { %3518 = vsyncpa [#allocation8], 1 }
 0xe2f   :  { %3519 = vsyncpa [#allocation11], 1 }
 0xe30   :  { %3521 = vsyncpa [#allocation11 + $0x1], 1 }
 0xe31   :  { %3522 = vsyncpa [#allocation14], 1 }
 0xe32   :  { %3524 = vsyncpa [#allocation14 + $0x1], 1 }
 0xe33   :  { %3525 = vsyncpa [#allocation17], 1 }
 0xe34   :  { %3526 = vsyncpa [#allocation6], 1 }
 0xe35   :  { %3528 = vsyncpa [#allocation6 + $0x1], 1 }

</bundles_post_ra>
